<compile_context>
chip_gen: v5e
topology: v5e:2x2
jax: 0.10.0
libtpu: 0.0.40
codegen_flags: <defaults>
</compile_context>

<pallas_src>
import functools

import numpy as np

import jax
import jax.numpy as jnp
from jax import lax
from jax.experimental import pallas as pl
from jax.experimental.pallas import tpu as pltpu


# ----------------------------------------------------------------------------
# Fused kernel: conv1..conv6 (+ReLU, 3x MaxPool) -> flatten -> fc1+ReLU ->
# fc2 -> log_softmax, on one batch tile of BT samples (all in vregs/VMEM).
# ----------------------------------------------------------------------------
def _cnn_g_kernel(x_ref,
                  w1, b1, w2, b2, w3, b3, w4, b4, w5, b5, w6, b6,
                  fw1, fb1, fw2, fb2,
                  o_ref,
                  *, BT, L):
    f32 = jnp.float32

    # Per-sample boundary masks for the batch-folded (BT*lcur, C) row layout.
    # Built from traced 2-D iotas (NOT numpy constants — Pallas rejects
    # captured array constants), once per distinct row count.
    def keep_masks(lcur):
        pos = lax.broadcasted_iota(jnp.int32, (BT * lcur, 1), 0) % lcur
        return pos != 0, pos != (lcur - 1)

    masks = {lc: keep_masks(lc) for lc in (L, L // 2, L // 4)}

    def conv3_relu(h, w_ref, b_ref, lcur):
        # h: (R, Cin) batch-folded rows, R = BT * lcur.
        # Conv1d(k=3, pad=1) as three accumulated MXU dots with per-tap
        # weights (no lane-sparse im2col concat).  The +-1 shifted operands
        # are built in-register from value slices (no VMEM halo scratch);
        # rows that would cross a sample boundary are zeroed by the masks.
        not_first, not_last = masks[lcur]
        z = jnp.zeros_like(h[0:1, :])
        prev = jnp.where(not_first,
                         jnp.concatenate([z, h[:-1, :]], axis=0), 0.0)
        nxt = jnp.where(not_last,
                        jnp.concatenate([h[1:, :], z], axis=0), 0.0)
        wp = w_ref[0]                       # tap l-1  (Cin, Cout)
        wc = w_ref[1]                       # tap l
        wn = w_ref[2]                       # tap l+1
        cdt = wc.dtype                      # bf16 or f32 MXU operands
        y = jnp.dot(h.astype(cdt), wc, preferred_element_type=f32)
        y = y + jnp.dot(prev.astype(cdt), wp, preferred_element_type=f32)
        y = y + jnp.dot(nxt.astype(cdt), wn, preferred_element_type=f32)
        return jnp.maximum(y + b_ref[...], 0.0)

    def maxpool2(h):
        # MaxPool1d(kernel=2, stride=2): in-register pairwise max of adjacent
        # rows (lcur is even, so pairs never straddle a sample boundary).
        R, C = h.shape
        return jnp.max(h.reshape(R // 2, 2, C), axis=1)

    x = x_ref[...].astype(f32)              # (BT*L, num_feats)

    h = conv3_relu(x, w1, b1, L)
    h = conv3_relu(h, w2, b2, L)
    h = maxpool2(h)                          # (BT*L/2, 32)

    h = conv3_relu(h, w3, b3, L // 2)
    h = conv3_relu(h, w4, b4, L // 2)
    h = maxpool2(h)                          # (BT*L/4, 64)

    h = conv3_relu(h, w5, b5, L // 4)
    h = conv3_relu(h, w6, b6, L // 4)
    h = maxpool2(h)                          # (BT*L/8, 128)

    # Dropout layers are identity in eval / inference mode.
    # Flatten == plain reshape: rows are sample-major / position-minor, and
    # the torch channel-major flatten permutation is folded into fw1's row
    # order (pack_params), so no transpose / gather / scratch is needed.
    L8 = L // 8
    flat = h.reshape(BT, L8 * 128)

    fw1v = fw1[...]
    h1 = jnp.dot(flat.astype(fw1v.dtype), fw1v,
                 preferred_element_type=f32) + fb1[...]
    h1 = jnp.maximum(h1, 0.0)
    fw2v = fw2[...]
    logits = jnp.dot(h1.astype(fw2v.dtype), fw2v,
                     preferred_element_type=f32) + fb2[...]

    m = jnp.max(logits, axis=-1, keepdims=True)
    s = logits - m
    lse = jnp.log(jnp.sum(jnp.exp(s), axis=-1, keepdims=True))
    o_ref[...] = (s - lse).astype(o_ref.dtype)


# ----------------------------------------------------------------------------
# Wrapper
# ----------------------------------------------------------------------------
def cnn_g_forward(params, x, *, L, num_classes, batch_tile=None,
                  vmem_limit_bytes=None):
    """params: packed kernel-layout params (see pack_params);
    x: (B, L, num_feats) float32."""
    B, Lx, F = x.shape
    assert Lx == L and L % 8 == 0, "L must be a multiple of 8"

    if batch_tile is None:
        # Primary tuning knob: prefer large tiles (MXU-sized matmul M) while
        # keeping >= 2 grid steps so the "parallel" axis can shard across
        # v7x's two TensorCores.  Small B just runs as a single tile.
        batch_tile = B
        for cand in (512, 256, 128, 64, 32, 16, 8):
            if B % cand == 0 and B // cand >= 2:
                batch_tile = cand
                break
    BT = batch_tile
    assert B % BT == 0
    nbt = B // BT

    x2 = x.reshape(B * L, F)                 # row-major fold: free layout change
    # TODO(synk): for very large BT, repack x lane-dense ((B, L*F) blocks) so
    # the input DMA is not a (., num_feats)-lane narrow strided transfer.

    kernel = functools.partial(_cnn_g_kernel, BT=BT, L=L)

    in_specs = [pl.BlockSpec((BT * L, F), lambda i: (i, 0))]
    args = [x2]
    for idx in range(1, 7):
        w = params[f"cw{idx}"]               # (3, Cin, Cout)
        b = params[f"cb{idx}"]               # (1, Cout)
        in_specs.append(pl.BlockSpec(w.shape, lambda i: (0, 0, 0)))
        in_specs.append(pl.BlockSpec(b.shape, lambda i: (0, 0)))
        args += [w, b]
    for name in ("fw1", "fb1", "fw2", "fb2"):
        in_specs.append(pl.BlockSpec(params[name].shape, lambda i: (0, 0)))
        args.append(params[name])

    ckw = dict(dimension_semantics=("parallel",))   # megacore on v7x
    if vmem_limit_bytes is not None:
        # v5e default scoped VMEM is 16 MiB; v7x physical VMEM is 64 MiB —
        # raise explicitly when running large batch tiles.
        ckw["vmem_limit_bytes"] = int(vmem_limit_bytes)

    return pl.pallas_call(
        kernel,
        out_shape=jax.ShapeDtypeStruct((B, num_classes), jnp.float32),
        grid=(nbt,),
        in_specs=in_specs,
        out_specs=pl.BlockSpec((BT, num_classes), lambda i: (i, 0)),
        compiler_params=pltpu.CompilerParams(**ckw),
    )(*args)


# ----------------------------------------------------------------------------
# Parameters (PyTorch layouts) + one-time repacking to kernel layouts
# ----------------------------------------------------------------------------
def init_torch_params(key, num_feats, k=5, L=16):
    """Synthetic parameters in the PyTorch layouts of CNN_G."""
    assert L % 8 == 0
    chans = [(num_feats, 32), (32, 32), (32, 64), (64, 64), (64, 128),
             (128, 128)]
    keys = jax.random.split(key, 2 * len(chans) + 4)
    tp, ki = {}, 0
    for i, (cin, cout) in enumerate(chans, start=1):
        bound = 1.0 / float(np.sqrt(3.0 * cin))
        tp[f"c{i}w"] = jax.random.uniform(keys[ki], (cout, cin, 3),
                                          jnp.float32, -bound, bound)
        tp[f"c{i}b"] = jax.random.uniform(keys[ki + 1], (cout,),
                                          jnp.float32, -bound, bound)
        ki += 2
    dim = (L // 8) * 128
    hid = dim // 4
    bound = 1.0 / float(np.sqrt(dim))
    tp["f1w"] = jax.random.uniform(keys[ki], (hid, dim), jnp.float32,
                                   -bound, bound)
    tp["f1b"] = jax.random.uniform(keys[ki + 1], (hid,), jnp.float32,
                                   -bound, bound)
    bound = 1.0 / float(np.sqrt(hid))
    tp["f2w"] = jax.random.uniform(keys[ki + 2], (k, hid), jnp.float32,
                                   -bound, bound)
    tp["f2b"] = jax.random.uniform(keys[ki + 3], (k,), jnp.float32,
                                   -bound, bound)
    return tp


def pack_params(tp, *, L, matmul_dtype=jnp.float32):
    """PyTorch layouts -> kernel layouts (one-time, outside the hot path).

    * Conv1d weight (Cout, Cin, 3) -> per-tap matmul weight (3, Cin, Cout).
    * fc1 weight (hid, dim) rows permuted from the torch channel-major
      flatten order (c*L8 + l) to the kernel's position-major order
      (l*128 + c), so the kernel's flatten is a plain reshape.
    * Matmul weights stored in `matmul_dtype` (e.g. bf16 for MXU-native
      passes); biases stay f32 (accumulation / elementwise math is f32).
    """
    L8 = L // 8
    C = 128
    p = {}
    for i in range(1, 7):
        w = tp[f"c{i}w"]                                        # (Cout, Cin, 3)
        p[f"cw{i}"] = jnp.transpose(w, (2, 1, 0)).astype(matmul_dtype)
        p[f"cb{i}"] = tp[f"c{i}b"].reshape(1, -1).astype(jnp.float32)
    f1t = tp["f1w"].T                                           # (dim, hid)
    hid = f1t.shape[1]
    p["fw1"] = (f1t.reshape(C, L8, hid).transpose(1, 0, 2)
                .reshape(C * L8, hid).astype(matmul_dtype))
    p["fb1"] = tp["f1b"].reshape(1, hid).astype(jnp.float32)
    p["fw2"] = tp["f2w"].T.astype(matmul_dtype)
    p["fb2"] = tp["f2b"].reshape(1, -1).astype(jnp.float32)
    return p


def ref_forward(tp, x):
    """Pure-JAX replica of the PyTorch CNN_G.forward (eval mode)."""
    hp = jax.lax.Precision.HIGHEST
    h = jnp.transpose(x, (0, 2, 1))                             # NCW

    def conv(h, w, b):
        y = jax.lax.conv_general_dilated(
            h, w, window_strides=(1,), padding=[(1, 1)],
            dimension_numbers=("NCH", "OIH", "NCH"), precision=hp)
        return jax.nn.relu(y + b[None, :, None])

    def pool(h):
        b_, c_, l_ = h.shape
        return jnp.max(h.reshape(b_, c_, l_ // 2, 2), axis=-1)

    h = pool(conv(conv(h, tp["c1w"], tp["c1b"]), tp["c2w"], tp["c2b"]))
    h = pool(conv(conv(h, tp["c3w"], tp["c3b"]), tp["c4w"], tp["c4b"]))
    h = pool(conv(conv(h, tp["c5w"], tp["c5b"]), tp["c6w"], tp["c6b"]))
    flat = h.reshape(h.shape[0], -1)                            # channel-major
    h1 = jax.nn.relu(jnp.dot(flat, tp["f1w"].T, precision=hp) + tp["f1b"])
    logits = jnp.dot(h1, tp["f2w"].T, precision=hp) + tp["f2b"]
    return jax.nn.log_softmax(logits, axis=-1)


# ----------------------------------------------------------------------------
if __name__ == "__main__":
    B, L, NUM_FEATS, K = 2, 16, 4, 5

    root = jax.random.PRNGKey(0)
    kx, kp = jax.random.split(root)
    x = jax.random.normal(kx, (B, L, NUM_FEATS), jnp.float32)

    torch_params = init_torch_params(kp, NUM_FEATS, k=K, L=L)
    ref = ref_forward(torch_params, x)

    # f32 matmul path: tight numerical check against the PyTorch-equivalent ref.
    packed = pack_params(torch_params, L=L)
    out = jax.block_until_ready(cnn_g_forward(packed, x, L=L, num_classes=K))
    assert out.shape == (B, K), out.shape
    assert jnp.allclose(jnp.sum(jnp.exp(out), axis=1), 1.0, atol=1e-4)
    assert jnp.allclose(out, ref, atol=2e-2, rtol=2e-2), (out, ref)

    # bf16 MXU-operand path (perf review #5): weights stored bf16, activations
    # cast per dot, accumulation / bias / ReLU / log_softmax kept in f32.
    packed_bf16 = pack_params(torch_params, L=L, matmul_dtype=jnp.bfloat16)
    out_bf = jax.block_until_ready(
        cnn_g_forward(packed_bf16, x, L=L, num_classes=K))
    assert out_bf.shape == (B, K), out_bf.shape
    assert jnp.allclose(jnp.sum(jnp.exp(out_bf), axis=1), 1.0, atol=1e-3)
    assert jnp.allclose(out_bf, ref, atol=0.25, rtol=0.1), (out_bf, ref)

    print("KERNEL_OK")
</pallas_src>

<mosaic_0001>
module attributes {stable_mosaic.version = 11 : i64} {
  func.func @_cnn_g_kernel(%arg0: i32, %arg1: memref<32x4xf32, #tpu.memory_space<vmem>>, %arg2: memref<3x4x32xf32, #tpu.memory_space<vmem>>, %arg3: memref<1x32xf32, #tpu.memory_space<vmem>>, %arg4: memref<3x32x32xf32, #tpu.memory_space<vmem>>, %arg5: memref<1x32xf32, #tpu.memory_space<vmem>>, %arg6: memref<3x32x64xf32, #tpu.memory_space<vmem>>, %arg7: memref<1x64xf32, #tpu.memory_space<vmem>>, %arg8: memref<3x64x64xf32, #tpu.memory_space<vmem>>, %arg9: memref<1x64xf32, #tpu.memory_space<vmem>>, %arg10: memref<3x64x128xf32, #tpu.memory_space<vmem>>, %arg11: memref<1x128xf32, #tpu.memory_space<vmem>>, %arg12: memref<3x128x128xf32, #tpu.memory_space<vmem>>, %arg13: memref<1x128xf32, #tpu.memory_space<vmem>>, %arg14: memref<256x64xf32, #tpu.memory_space<vmem>>, %arg15: memref<1x64xf32, #tpu.memory_space<vmem>>, %arg16: memref<64x5xf32, #tpu.memory_space<vmem>>, %arg17: memref<1x5xf32, #tpu.memory_space<vmem>>, %arg18: memref<2x5xf32, #tpu.memory_space<vmem>>) attributes {dimension_semantics = [#tpu.dimension_semantics<parallel>], iteration_bounds = array<i64: 1>, scalar_prefetch = 0 : i64, scratch_operands = 0 : i64, tpu.core_type = #tpu.core_type<tc>, window_params = [{transform_indices = @transform_0, window_bounds = array<i64: 32, 4>}, {pipeline_mode = #tpu.pipeline_mode<synchronous>, transform_indices = @transform_1, window_bounds = array<i64: 3, 4, 32>}, {pipeline_mode = #tpu.pipeline_mode<synchronous>, transform_indices = @transform_2, window_bounds = array<i64: 1, 32>}, {pipeline_mode = #tpu.pipeline_mode<synchronous>, transform_indices = @transform_3, window_bounds = array<i64: 3, 32, 32>}, {pipeline_mode = #tpu.pipeline_mode<synchronous>, transform_indices = @transform_4, window_bounds = array<i64: 1, 32>}, {pipeline_mode = #tpu.pipeline_mode<synchronous>, transform_indices = @transform_5, window_bounds = array<i64: 3, 32, 64>}, {pipeline_mode = #tpu.pipeline_mode<synchronous>, transform_indices = @transform_6, window_bounds = array<i64: 1, 64>}, {pipeline_mode = #tpu.pipeline_mode<synchronous>, transform_indices = @transform_7, window_bounds = array<i64: 3, 64, 64>}, {pipeline_mode = #tpu.pipeline_mode<synchronous>, transform_indices = @transform_8, window_bounds = array<i64: 1, 64>}, {pipeline_mode = #tpu.pipeline_mode<synchronous>, transform_indices = @transform_9, window_bounds = array<i64: 3, 64, 128>}, {pipeline_mode = #tpu.pipeline_mode<synchronous>, transform_indices = @transform_10, window_bounds = array<i64: 1, 128>}, {pipeline_mode = #tpu.pipeline_mode<synchronous>, transform_indices = @transform_11, window_bounds = array<i64: 3, 128, 128>}, {pipeline_mode = #tpu.pipeline_mode<synchronous>, transform_indices = @transform_12, window_bounds = array<i64: 1, 128>}, {pipeline_mode = #tpu.pipeline_mode<synchronous>, transform_indices = @transform_13, window_bounds = array<i64: 256, 64>}, {pipeline_mode = #tpu.pipeline_mode<synchronous>, transform_indices = @transform_14, window_bounds = array<i64: 1, 64>}, {pipeline_mode = #tpu.pipeline_mode<synchronous>, transform_indices = @transform_15, window_bounds = array<i64: 64, 5>}, {pipeline_mode = #tpu.pipeline_mode<synchronous>, transform_indices = @transform_16, window_bounds = array<i64: 1, 5>}, {transform_indices = @transform_17, window_bounds = array<i64: 2, 5>}]} {
    %0 = tpu.iota {dimensions = array<i32: 0>} : vector<32x1xi32>
    %c16_i32 = arith.constant 16 : i32
    %c0_i32 = arith.constant 0 : i32
    %1 = arith.cmpi eq, %c16_i32, %c0_i32 : i32
    %c1_i32 = arith.constant 1 : i32
    %2 = arith.select %1, %c1_i32, %c16_i32 : i32
    %3 = vector.broadcast %2 : i32 to vector<32x1xi32>
    %4 = arith.remsi %0, %3 : vector<32x1xi32>
    %c0_i32_0 = arith.constant 0 : i32
    %5 = vector.broadcast %c0_i32_0 : i32 to vector<32x1xi32>
    %6 = arith.cmpi ne, %4, %5 : vector<32x1xi32>
    %c0_i32_1 = arith.constant 0 : i32
    %7 = vector.broadcast %c0_i32_1 : i32 to vector<32x1xi32>
    %8 = arith.cmpi slt, %4, %7 : vector<32x1xi32>
    %c0_i32_2 = arith.constant 0 : i32
    %9 = arith.cmpi slt, %2, %c0_i32_2 : i32
    %10 = vector.broadcast %9 : i1 to vector<32x1xi1>
    %11 = vector.broadcast %10 : vector<32x1xi1> to vector<32x1xi1>
    %12 = arith.xori %8, %11 : vector<32x1xi1>
    %13 = arith.andi %12, %6 : vector<32x1xi1>
    %14 = vector.broadcast %2 : i32 to vector<32x1xi32>
    %15 = arith.addi %4, %14 : vector<32x1xi32>
    %16 = arith.select %13, %15, %4 : vector<32x1xi1>, vector<32x1xi32>
    %c0_i32_3 = arith.constant 0 : i32
    %17 = vector.broadcast %c0_i32_3 : i32 to vector<32x1xi32>
    %18 = arith.cmpi ne, %16, %17 : vector<32x1xi32>
    %c15_i32 = arith.constant 15 : i32
    %19 = vector.broadcast %c15_i32 : i32 to vector<32x1xi32>
    %20 = arith.cmpi ne, %16, %19 : vector<32x1xi32>
    %21 = tpu.iota {dimensions = array<i32: 0>} : vector<16x1xi32>
    %c8_i32 = arith.constant 8 : i32
    %c0_i32_4 = arith.constant 0 : i32
    %22 = arith.cmpi eq, %c8_i32, %c0_i32_4 : i32
    %c1_i32_5 = arith.constant 1 : i32
    %23 = arith.select %22, %c1_i32_5, %c8_i32 : i32
    %24 = vector.broadcast %23 : i32 to vector<16x1xi32>
    %25 = arith.remsi %21, %24 : vector<16x1xi32>
    %c0_i32_6 = arith.constant 0 : i32
    %26 = vector.broadcast %c0_i32_6 : i32 to vector<16x1xi32>
    %27 = arith.cmpi ne, %25, %26 : vector<16x1xi32>
    %c0_i32_7 = arith.constant 0 : i32
    %28 = vector.broadcast %c0_i32_7 : i32 to vector<16x1xi32>
    %29 = arith.cmpi slt, %25, %28 : vector<16x1xi32>
    %c0_i32_8 = arith.constant 0 : i32
    %30 = arith.cmpi slt, %23, %c0_i32_8 : i32
    %31 = vector.broadcast %30 : i1 to vector<16x1xi1>
    %32 = vector.broadcast %31 : vector<16x1xi1> to vector<16x1xi1>
    %33 = arith.xori %29, %32 : vector<16x1xi1>
    %34 = arith.andi %33, %27 : vector<16x1xi1>
    %35 = vector.broadcast %23 : i32 to vector<16x1xi32>
    %36 = arith.addi %25, %35 : vector<16x1xi32>
    %37 = arith.select %34, %36, %25 : vector<16x1xi1>, vector<16x1xi32>
    %c0_i32_9 = arith.constant 0 : i32
    %38 = vector.broadcast %c0_i32_9 : i32 to vector<16x1xi32>
    %39 = arith.cmpi ne, %37, %38 : vector<16x1xi32>
    %c7_i32 = arith.constant 7 : i32
    %40 = vector.broadcast %c7_i32 : i32 to vector<16x1xi32>
    %41 = arith.cmpi ne, %37, %40 : vector<16x1xi32>
    %42 = tpu.iota {dimensions = array<i32: 0>} : vector<8x1xi32>
    %c4_i32 = arith.constant 4 : i32
    %c0_i32_10 = arith.constant 0 : i32
    %43 = arith.cmpi eq, %c4_i32, %c0_i32_10 : i32
    %c1_i32_11 = arith.constant 1 : i32
    %44 = arith.select %43, %c1_i32_11, %c4_i32 : i32
    %45 = vector.broadcast %44 : i32 to vector<8x1xi32>
    %46 = arith.remsi %42, %45 : vector<8x1xi32>
    %c0_i32_12 = arith.constant 0 : i32
    %47 = vector.broadcast %c0_i32_12 : i32 to vector<8x1xi32>
    %48 = arith.cmpi ne, %46, %47 : vector<8x1xi32>
    %c0_i32_13 = arith.constant 0 : i32
    %49 = vector.broadcast %c0_i32_13 : i32 to vector<8x1xi32>
    %50 = arith.cmpi slt, %46, %49 : vector<8x1xi32>
    %c0_i32_14 = arith.constant 0 : i32
    %51 = arith.cmpi slt, %44, %c0_i32_14 : i32
    %52 = vector.broadcast %51 : i1 to vector<8x1xi1>
    %53 = vector.broadcast %52 : vector<8x1xi1> to vector<8x1xi1>
    %54 = arith.xori %50, %53 : vector<8x1xi1>
    %55 = arith.andi %54, %48 : vector<8x1xi1>
    %56 = vector.broadcast %44 : i32 to vector<8x1xi32>
    %57 = arith.addi %46, %56 : vector<8x1xi32>
    %58 = arith.select %55, %57, %46 : vector<8x1xi1>, vector<8x1xi32>
    %c0_i32_15 = arith.constant 0 : i32
    %59 = vector.broadcast %c0_i32_15 : i32 to vector<8x1xi32>
    %60 = arith.cmpi ne, %58, %59 : vector<8x1xi32>
    %c3_i32 = arith.constant 3 : i32
    %61 = vector.broadcast %c3_i32 : i32 to vector<8x1xi32>
    %62 = arith.cmpi ne, %58, %61 : vector<8x1xi32>
    %c0 = arith.constant 0 : index
    %c0_16 = arith.constant 0 : index
    %63 = vector.load %arg1[%c0, %c0_16] : memref<32x4xf32, #tpu.memory_space<vmem>>, vector<32x4xf32>
    %cst = arith.constant 0.000000e+00 : f32
    %64 = vector.broadcast %cst : f32 to vector<1x4xf32>
    %65 = vector.extract_strided_slice %63 {offsets = [0, 0], sizes = [31, 4], strides = [1, 1]} : vector<32x4xf32> to vector<31x4xf32>
    %66 = tpu.concatenate %64, %65 in 0 : vector<1x4xf32>, vector<31x4xf32> -> vector<32x4xf32>
    %cst_17 = arith.constant 0.000000e+00 : f32
    %67 = vector.shape_cast %18 : vector<32x1xi1> to vector<32x1xi1>
    %68 = vector.broadcast %67 : vector<32x1xi1> to vector<32x4xi1>
    %69 = vector.broadcast %cst_17 : f32 to vector<32x4xf32>
    %70 = arith.select %68, %66, %69 : vector<32x4xi1>, vector<32x4xf32>
    %71 = vector.extract_strided_slice %63 {offsets = [1, 0], sizes = [31, 4], strides = [1, 1]} : vector<32x4xf32> to vector<31x4xf32>
    %72 = tpu.concatenate %71, %64 in 0 : vector<31x4xf32>, vector<1x4xf32> -> vector<32x4xf32>
    %cst_18 = arith.constant 0.000000e+00 : f32
    %73 = vector.shape_cast %20 : vector<32x1xi1> to vector<32x1xi1>
    %74 = vector.broadcast %73 : vector<32x1xi1> to vector<32x4xi1>
    %75 = vector.broadcast %cst_18 : f32 to vector<32x4xf32>
    %76 = arith.select %74, %72, %75 : vector<32x4xi1>, vector<32x4xf32>
    %c0_19 = arith.constant 0 : index
    %c0_20 = arith.constant 0 : index
    %c0_21 = arith.constant 0 : index
    %77 = vector.load %arg2[%c0_19, %c0_20, %c0_21] : memref<3x4x32xf32, #tpu.memory_space<vmem>>, vector<1x4x32xf32>
    %78 = vector.shape_cast %77 : vector<1x4x32xf32> to vector<4x32xf32>
    %c1 = arith.constant 1 : index
    %c0_22 = arith.constant 0 : index
    %c0_23 = arith.constant 0 : index
    %79 = vector.load %arg2[%c1, %c0_22, %c0_23] : memref<3x4x32xf32, #tpu.memory_space<vmem>>, vector<1x4x32xf32>
    %80 = vector.shape_cast %79 : vector<1x4x32xf32> to vector<4x32xf32>
    %c2 = arith.constant 2 : index
    %c0_24 = arith.constant 0 : index
    %c0_25 = arith.constant 0 : index
    %81 = vector.load %arg2[%c2, %c0_24, %c0_25] : memref<3x4x32xf32, #tpu.memory_space<vmem>>, vector<1x4x32xf32>
    %82 = vector.shape_cast %81 : vector<1x4x32xf32> to vector<4x32xf32>
    %cst_26 = arith.constant dense<0.000000e+00> : vector<32x32xf32>
    %83 = tpu.matmul %63, %80, %cst_26 {dimension_numbers = #tpu.dot_dimension_numbers<[1], [0], [0], [1], [0, 0, 1, 1], [], []>} : vector<32x4xf32>, vector<4x32xf32>, vector<32x32xf32> -> vector<32x32xf32>
    %cst_27 = arith.constant dense<0.000000e+00> : vector<32x32xf32>
    %84 = tpu.matmul %70, %78, %cst_27 {dimension_numbers = #tpu.dot_dimension_numbers<[1], [0], [0], [1], [0, 0, 1, 1], [], []>} : vector<32x4xf32>, vector<4x32xf32>, vector<32x32xf32> -> vector<32x32xf32>
    %85 = arith.addf %83, %84 : vector<32x32xf32>
    %cst_28 = arith.constant dense<0.000000e+00> : vector<32x32xf32>
    %86 = tpu.matmul %76, %82, %cst_28 {dimension_numbers = #tpu.dot_dimension_numbers<[1], [0], [0], [1], [0, 0, 1, 1], [], []>} : vector<32x4xf32>, vector<4x32xf32>, vector<32x32xf32> -> vector<32x32xf32>
    %87 = arith.addf %85, %86 : vector<32x32xf32>
    %c0_29 = arith.constant 0 : index
    %c0_30 = arith.constant 0 : index
    %88 = vector.load %arg3[%c0_29, %c0_30] : memref<1x32xf32, #tpu.memory_space<vmem>>, vector<1x32xf32>
    %89 = vector.broadcast %88 : vector<1x32xf32> to vector<32x32xf32>
    %90 = arith.addf %87, %89 : vector<32x32xf32>
    %cst_31 = arith.constant 0.000000e+00 : f32
    %91 = vector.broadcast %cst_31 : f32 to vector<32x32xf32>
    %92 = arith.maximumf %90, %91 : vector<32x32xf32>
    %cst_32 = arith.constant 0.000000e+00 : f32
    %93 = vector.broadcast %cst_32 : f32 to vector<1x32xf32>
    %94 = vector.extract_strided_slice %92 {offsets = [0, 0], sizes = [31, 32], strides = [1, 1]} : vector<32x32xf32> to vector<31x32xf32>
    %95 = tpu.concatenate %93, %94 in 0 : vector<1x32xf32>, vector<31x32xf32> -> vector<32x32xf32>
    %cst_33 = arith.constant 0.000000e+00 : f32
    %96 = vector.shape_cast %18 : vector<32x1xi1> to vector<32x1xi1>
    %97 = vector.broadcast %96 : vector<32x1xi1> to vector<32x32xi1>
    %98 = vector.broadcast %cst_33 : f32 to vector<32x32xf32>
    %99 = arith.select %97, %95, %98 : vector<32x32xi1>, vector<32x32xf32>
    %100 = vector.extract_strided_slice %92 {offsets = [1, 0], sizes = [31, 32], strides = [1, 1]} : vector<32x32xf32> to vector<31x32xf32>
    %101 = tpu.concatenate %100, %93 in 0 : vector<31x32xf32>, vector<1x32xf32> -> vector<32x32xf32>
    %cst_34 = arith.constant 0.000000e+00 : f32
    %102 = vector.shape_cast %20 : vector<32x1xi1> to vector<32x1xi1>
    %103 = vector.broadcast %102 : vector<32x1xi1> to vector<32x32xi1>
    %104 = vector.broadcast %cst_34 : f32 to vector<32x32xf32>
    %105 = arith.select %103, %101, %104 : vector<32x32xi1>, vector<32x32xf32>
    %c0_35 = arith.constant 0 : index
    %c0_36 = arith.constant 0 : index
    %c0_37 = arith.constant 0 : index
    %106 = vector.load %arg4[%c0_35, %c0_36, %c0_37] : memref<3x32x32xf32, #tpu.memory_space<vmem>>, vector<1x32x32xf32>
    %107 = vector.shape_cast %106 : vector<1x32x32xf32> to vector<32x32xf32>
    %c1_38 = arith.constant 1 : index
    %c0_39 = arith.constant 0 : index
    %c0_40 = arith.constant 0 : index
    %108 = vector.load %arg4[%c1_38, %c0_39, %c0_40] : memref<3x32x32xf32, #tpu.memory_space<vmem>>, vector<1x32x32xf32>
    %109 = vector.shape_cast %108 : vector<1x32x32xf32> to vector<32x32xf32>
    %c2_41 = arith.constant 2 : index
    %c0_42 = arith.constant 0 : index
    %c0_43 = arith.constant 0 : index
    %110 = vector.load %arg4[%c2_41, %c0_42, %c0_43] : memref<3x32x32xf32, #tpu.memory_space<vmem>>, vector<1x32x32xf32>
    %111 = vector.shape_cast %110 : vector<1x32x32xf32> to vector<32x32xf32>
    %cst_44 = arith.constant dense<0.000000e+00> : vector<32x32xf32>
    %112 = tpu.matmul %92, %109, %cst_44 {dimension_numbers = #tpu.dot_dimension_numbers<[1], [0], [0], [1], [0, 0, 1, 1], [], []>} : vector<32x32xf32>, vector<32x32xf32>, vector<32x32xf32> -> vector<32x32xf32>
    %cst_45 = arith.constant dense<0.000000e+00> : vector<32x32xf32>
    %113 = tpu.matmul %99, %107, %cst_45 {dimension_numbers = #tpu.dot_dimension_numbers<[1], [0], [0], [1], [0, 0, 1, 1], [], []>} : vector<32x32xf32>, vector<32x32xf32>, vector<32x32xf32> -> vector<32x32xf32>
    %114 = arith.addf %112, %113 : vector<32x32xf32>
    %cst_46 = arith.constant dense<0.000000e+00> : vector<32x32xf32>
    %115 = tpu.matmul %105, %111, %cst_46 {dimension_numbers = #tpu.dot_dimension_numbers<[1], [0], [0], [1], [0, 0, 1, 1], [], []>} : vector<32x32xf32>, vector<32x32xf32>, vector<32x32xf32> -> vector<32x32xf32>
    %116 = arith.addf %114, %115 : vector<32x32xf32>
    %c0_47 = arith.constant 0 : index
    %c0_48 = arith.constant 0 : index
    %117 = vector.load %arg5[%c0_47, %c0_48] : memref<1x32xf32, #tpu.memory_space<vmem>>, vector<1x32xf32>
    %118 = vector.broadcast %117 : vector<1x32xf32> to vector<32x32xf32>
    %119 = arith.addf %116, %118 : vector<32x32xf32>
    %cst_49 = arith.constant 0.000000e+00 : f32
    %120 = vector.broadcast %cst_49 : f32 to vector<32x32xf32>
    %121 = arith.maximumf %119, %120 : vector<32x32xf32>
    %122 = vector.shape_cast %121 : vector<32x32xf32> to vector<16x2x32xf32>
    %cst_50 = arith.constant dense<0xFF800000> : vector<16x32xf32>
    %123 = vector.multi_reduction <maximumf>, %122, %cst_50 [1] : vector<16x2x32xf32> to vector<16x32xf32>
    %cst_51 = arith.constant 0.000000e+00 : f32
    %124 = vector.broadcast %cst_51 : f32 to vector<1x32xf32>
    %125 = vector.extract_strided_slice %123 {offsets = [0, 0], sizes = [15, 32], strides = [1, 1]} : vector<16x32xf32> to vector<15x32xf32>
    %126 = tpu.concatenate %124, %125 in 0 : vector<1x32xf32>, vector<15x32xf32> -> vector<16x32xf32>
    %cst_52 = arith.constant 0.000000e+00 : f32
    %127 = vector.shape_cast %39 : vector<16x1xi1> to vector<16x1xi1>
    %128 = vector.broadcast %127 : vector<16x1xi1> to vector<16x32xi1>
    %129 = vector.broadcast %cst_52 : f32 to vector<16x32xf32>
    %130 = arith.select %128, %126, %129 : vector<16x32xi1>, vector<16x32xf32>
    %131 = vector.extract_strided_slice %123 {offsets = [1, 0], sizes = [15, 32], strides = [1, 1]} : vector<16x32xf32> to vector<15x32xf32>
    %132 = tpu.concatenate %131, %124 in 0 : vector<15x32xf32>, vector<1x32xf32> -> vector<16x32xf32>
    %cst_53 = arith.constant 0.000000e+00 : f32
    %133 = vector.shape_cast %41 : vector<16x1xi1> to vector<16x1xi1>
    %134 = vector.broadcast %133 : vector<16x1xi1> to vector<16x32xi1>
    %135 = vector.broadcast %cst_53 : f32 to vector<16x32xf32>
    %136 = arith.select %134, %132, %135 : vector<16x32xi1>, vector<16x32xf32>
    %c0_54 = arith.constant 0 : index
    %c0_55 = arith.constant 0 : index
    %c0_56 = arith.constant 0 : index
    %137 = vector.load %arg6[%c0_54, %c0_55, %c0_56] : memref<3x32x64xf32, #tpu.memory_space<vmem>>, vector<1x32x64xf32>
    %138 = vector.shape_cast %137 : vector<1x32x64xf32> to vector<32x64xf32>
    %c1_57 = arith.constant 1 : index
    %c0_58 = arith.constant 0 : index
    %c0_59 = arith.constant 0 : index
    %139 = vector.load %arg6[%c1_57, %c0_58, %c0_59] : memref<3x32x64xf32, #tpu.memory_space<vmem>>, vector<1x32x64xf32>
    %140 = vector.shape_cast %139 : vector<1x32x64xf32> to vector<32x64xf32>
    %c2_60 = arith.constant 2 : index
    %c0_61 = arith.constant 0 : index
    %c0_62 = arith.constant 0 : index
    %141 = vector.load %arg6[%c2_60, %c0_61, %c0_62] : memref<3x32x64xf32, #tpu.memory_space<vmem>>, vector<1x32x64xf32>
    %142 = vector.shape_cast %141 : vector<1x32x64xf32> to vector<32x64xf32>
    %cst_63 = arith.constant dense<0.000000e+00> : vector<16x64xf32>
    %143 = tpu.matmul %123, %140, %cst_63 {dimension_numbers = #tpu.dot_dimension_numbers<[1], [0], [0], [1], [0, 0, 1, 1], [], []>} : vector<16x32xf32>, vector<32x64xf32>, vector<16x64xf32> -> vector<16x64xf32>
    %cst_64 = arith.constant dense<0.000000e+00> : vector<16x64xf32>
    %144 = tpu.matmul %130, %138, %cst_64 {dimension_numbers = #tpu.dot_dimension_numbers<[1], [0], [0], [1], [0, 0, 1, 1], [], []>} : vector<16x32xf32>, vector<32x64xf32>, vector<16x64xf32> -> vector<16x64xf32>
    %145 = arith.addf %143, %144 : vector<16x64xf32>
    %cst_65 = arith.constant dense<0.000000e+00> : vector<16x64xf32>
    %146 = tpu.matmul %136, %142, %cst_65 {dimension_numbers = #tpu.dot_dimension_numbers<[1], [0], [0], [1], [0, 0, 1, 1], [], []>} : vector<16x32xf32>, vector<32x64xf32>, vector<16x64xf32> -> vector<16x64xf32>
    %147 = arith.addf %145, %146 : vector<16x64xf32>
    %c0_66 = arith.constant 0 : index
    %c0_67 = arith.constant 0 : index
    %148 = vector.load %arg7[%c0_66, %c0_67] : memref<1x64xf32, #tpu.memory_space<vmem>>, vector<1x64xf32>
    %149 = vector.broadcast %148 : vector<1x64xf32> to vector<16x64xf32>
    %150 = arith.addf %147, %149 : vector<16x64xf32>
    %cst_68 = arith.constant 0.000000e+00 : f32
    %151 = vector.broadcast %cst_68 : f32 to vector<16x64xf32>
    %152 = arith.maximumf %150, %151 : vector<16x64xf32>
    %cst_69 = arith.constant 0.000000e+00 : f32
    %153 = vector.broadcast %cst_69 : f32 to vector<1x64xf32>
    %154 = vector.extract_strided_slice %152 {offsets = [0, 0], sizes = [15, 64], strides = [1, 1]} : vector<16x64xf32> to vector<15x64xf32>
    %155 = tpu.concatenate %153, %154 in 0 : vector<1x64xf32>, vector<15x64xf32> -> vector<16x64xf32>
    %cst_70 = arith.constant 0.000000e+00 : f32
    %156 = vector.shape_cast %39 : vector<16x1xi1> to vector<16x1xi1>
    %157 = vector.broadcast %156 : vector<16x1xi1> to vector<16x64xi1>
    %158 = vector.broadcast %cst_70 : f32 to vector<16x64xf32>
    %159 = arith.select %157, %155, %158 : vector<16x64xi1>, vector<16x64xf32>
    %160 = vector.extract_strided_slice %152 {offsets = [1, 0], sizes = [15, 64], strides = [1, 1]} : vector<16x64xf32> to vector<15x64xf32>
    %161 = tpu.concatenate %160, %153 in 0 : vector<15x64xf32>, vector<1x64xf32> -> vector<16x64xf32>
    %cst_71 = arith.constant 0.000000e+00 : f32
    %162 = vector.shape_cast %41 : vector<16x1xi1> to vector<16x1xi1>
    %163 = vector.broadcast %162 : vector<16x1xi1> to vector<16x64xi1>
    %164 = vector.broadcast %cst_71 : f32 to vector<16x64xf32>
    %165 = arith.select %163, %161, %164 : vector<16x64xi1>, vector<16x64xf32>
    %c0_72 = arith.constant 0 : index
    %c0_73 = arith.constant 0 : index
    %c0_74 = arith.constant 0 : index
    %166 = vector.load %arg8[%c0_72, %c0_73, %c0_74] : memref<3x64x64xf32, #tpu.memory_space<vmem>>, vector<1x64x64xf32>
    %167 = vector.shape_cast %166 : vector<1x64x64xf32> to vector<64x64xf32>
    %c1_75 = arith.constant 1 : index
    %c0_76 = arith.constant 0 : index
    %c0_77 = arith.constant 0 : index
    %168 = vector.load %arg8[%c1_75, %c0_76, %c0_77] : memref<3x64x64xf32, #tpu.memory_space<vmem>>, vector<1x64x64xf32>
    %169 = vector.shape_cast %168 : vector<1x64x64xf32> to vector<64x64xf32>
    %c2_78 = arith.constant 2 : index
    %c0_79 = arith.constant 0 : index
    %c0_80 = arith.constant 0 : index
    %170 = vector.load %arg8[%c2_78, %c0_79, %c0_80] : memref<3x64x64xf32, #tpu.memory_space<vmem>>, vector<1x64x64xf32>
    %171 = vector.shape_cast %170 : vector<1x64x64xf32> to vector<64x64xf32>
    %cst_81 = arith.constant dense<0.000000e+00> : vector<16x64xf32>
    %172 = tpu.matmul %152, %169, %cst_81 {dimension_numbers = #tpu.dot_dimension_numbers<[1], [0], [0], [1], [0, 0, 1, 1], [], []>} : vector<16x64xf32>, vector<64x64xf32>, vector<16x64xf32> -> vector<16x64xf32>
    %cst_82 = arith.constant dense<0.000000e+00> : vector<16x64xf32>
    %173 = tpu.matmul %159, %167, %cst_82 {dimension_numbers = #tpu.dot_dimension_numbers<[1], [0], [0], [1], [0, 0, 1, 1], [], []>} : vector<16x64xf32>, vector<64x64xf32>, vector<16x64xf32> -> vector<16x64xf32>
    %174 = arith.addf %172, %173 : vector<16x64xf32>
    %cst_83 = arith.constant dense<0.000000e+00> : vector<16x64xf32>
    %175 = tpu.matmul %165, %171, %cst_83 {dimension_numbers = #tpu.dot_dimension_numbers<[1], [0], [0], [1], [0, 0, 1, 1], [], []>} : vector<16x64xf32>, vector<64x64xf32>, vector<16x64xf32> -> vector<16x64xf32>
    %176 = arith.addf %174, %175 : vector<16x64xf32>
    %c0_84 = arith.constant 0 : index
    %c0_85 = arith.constant 0 : index
    %177 = vector.load %arg9[%c0_84, %c0_85] : memref<1x64xf32, #tpu.memory_space<vmem>>, vector<1x64xf32>
    %178 = vector.broadcast %177 : vector<1x64xf32> to vector<16x64xf32>
    %179 = arith.addf %176, %178 : vector<16x64xf32>
    %cst_86 = arith.constant 0.000000e+00 : f32
    %180 = vector.broadcast %cst_86 : f32 to vector<16x64xf32>
    %181 = arith.maximumf %179, %180 : vector<16x64xf32>
    %182 = vector.shape_cast %181 : vector<16x64xf32> to vector<8x2x64xf32>
    %cst_87 = arith.constant dense<0xFF800000> : vector<8x64xf32>
    %183 = vector.multi_reduction <maximumf>, %182, %cst_87 [1] : vector<8x2x64xf32> to vector<8x64xf32>
    %cst_88 = arith.constant 0.000000e+00 : f32
    %184 = vector.broadcast %cst_88 : f32 to vector<1x64xf32>
    %185 = vector.extract_strided_slice %183 {offsets = [0, 0], sizes = [7, 64], strides = [1, 1]} : vector<8x64xf32> to vector<7x64xf32>
    %186 = tpu.concatenate %184, %185 in 0 : vector<1x64xf32>, vector<7x64xf32> -> vector<8x64xf32>
    %cst_89 = arith.constant 0.000000e+00 : f32
    %187 = vector.shape_cast %60 : vector<8x1xi1> to vector<8x1xi1>
    %188 = vector.broadcast %187 : vector<8x1xi1> to vector<8x64xi1>
    %189 = vector.broadcast %cst_89 : f32 to vector<8x64xf32>
    %190 = arith.select %188, %186, %189 : vector<8x64xi1>, vector<8x64xf32>
    %191 = vector.extract_strided_slice %183 {offsets = [1, 0], sizes = [7, 64], strides = [1, 1]} : vector<8x64xf32> to vector<7x64xf32>
    %192 = tpu.concatenate %191, %184 in 0 : vector<7x64xf32>, vector<1x64xf32> -> vector<8x64xf32>
    %cst_90 = arith.constant 0.000000e+00 : f32
    %193 = vector.shape_cast %62 : vector<8x1xi1> to vector<8x1xi1>
    %194 = vector.broadcast %193 : vector<8x1xi1> to vector<8x64xi1>
    %195 = vector.broadcast %cst_90 : f32 to vector<8x64xf32>
    %196 = arith.select %194, %192, %195 : vector<8x64xi1>, vector<8x64xf32>
    %c0_91 = arith.constant 0 : index
    %c0_92 = arith.constant 0 : index
    %c0_93 = arith.constant 0 : index
    %197 = vector.load %arg10[%c0_91, %c0_92, %c0_93] : memref<3x64x128xf32, #tpu.memory_space<vmem>>, vector<1x64x128xf32>
    %198 = vector.shape_cast %197 : vector<1x64x128xf32> to vector<64x128xf32>
    %c1_94 = arith.constant 1 : index
    %c0_95 = arith.constant 0 : index
    %c0_96 = arith.constant 0 : index
    %199 = vector.load %arg10[%c1_94, %c0_95, %c0_96] : memref<3x64x128xf32, #tpu.memory_space<vmem>>, vector<1x64x128xf32>
    %200 = vector.shape_cast %199 : vector<1x64x128xf32> to vector<64x128xf32>
    %c2_97 = arith.constant 2 : index
    %c0_98 = arith.constant 0 : index
    %c0_99 = arith.constant 0 : index
    %201 = vector.load %arg10[%c2_97, %c0_98, %c0_99] : memref<3x64x128xf32, #tpu.memory_space<vmem>>, vector<1x64x128xf32>
    %202 = vector.shape_cast %201 : vector<1x64x128xf32> to vector<64x128xf32>
    %cst_100 = arith.constant dense<0.000000e+00> : vector<8x128xf32>
    %203 = tpu.matmul %183, %200, %cst_100 {dimension_numbers = #tpu.dot_dimension_numbers<[1], [0], [0], [1], [0, 0, 1, 1], [], []>} : vector<8x64xf32>, vector<64x128xf32>, vector<8x128xf32> -> vector<8x128xf32>
    %cst_101 = arith.constant dense<0.000000e+00> : vector<8x128xf32>
    %204 = tpu.matmul %190, %198, %cst_101 {dimension_numbers = #tpu.dot_dimension_numbers<[1], [0], [0], [1], [0, 0, 1, 1], [], []>} : vector<8x64xf32>, vector<64x128xf32>, vector<8x128xf32> -> vector<8x128xf32>
    %205 = arith.addf %203, %204 : vector<8x128xf32>
    %cst_102 = arith.constant dense<0.000000e+00> : vector<8x128xf32>
    %206 = tpu.matmul %196, %202, %cst_102 {dimension_numbers = #tpu.dot_dimension_numbers<[1], [0], [0], [1], [0, 0, 1, 1], [], []>} : vector<8x64xf32>, vector<64x128xf32>, vector<8x128xf32> -> vector<8x128xf32>
    %207 = arith.addf %205, %206 : vector<8x128xf32>
    %c0_103 = arith.constant 0 : index
    %c0_104 = arith.constant 0 : index
    %208 = vector.load %arg11[%c0_103, %c0_104] : memref<1x128xf32, #tpu.memory_space<vmem>>, vector<1x128xf32>
    %209 = vector.broadcast %208 : vector<1x128xf32> to vector<8x128xf32>
    %210 = arith.addf %207, %209 : vector<8x128xf32>
    %cst_105 = arith.constant 0.000000e+00 : f32
    %211 = vector.broadcast %cst_105 : f32 to vector<8x128xf32>
    %212 = arith.maximumf %210, %211 : vector<8x128xf32>
    %cst_106 = arith.constant 0.000000e+00 : f32
    %213 = vector.broadcast %cst_106 : f32 to vector<1x128xf32>
    %214 = vector.extract_strided_slice %212 {offsets = [0, 0], sizes = [7, 128], strides = [1, 1]} : vector<8x128xf32> to vector<7x128xf32>
    %215 = tpu.concatenate %213, %214 in 0 : vector<1x128xf32>, vector<7x128xf32> -> vector<8x128xf32>
    %cst_107 = arith.constant 0.000000e+00 : f32
    %216 = vector.shape_cast %60 : vector<8x1xi1> to vector<8x1xi1>
    %217 = vector.broadcast %216 : vector<8x1xi1> to vector<8x128xi1>
    %218 = vector.broadcast %cst_107 : f32 to vector<8x128xf32>
    %219 = arith.select %217, %215, %218 : vector<8x128xi1>, vector<8x128xf32>
    %220 = vector.extract_strided_slice %212 {offsets = [1, 0], sizes = [7, 128], strides = [1, 1]} : vector<8x128xf32> to vector<7x128xf32>
    %221 = tpu.concatenate %220, %213 in 0 : vector<7x128xf32>, vector<1x128xf32> -> vector<8x128xf32>
    %cst_108 = arith.constant 0.000000e+00 : f32
    %222 = vector.shape_cast %62 : vector<8x1xi1> to vector<8x1xi1>
    %223 = vector.broadcast %222 : vector<8x1xi1> to vector<8x128xi1>
    %224 = vector.broadcast %cst_108 : f32 to vector<8x128xf32>
    %225 = arith.select %223, %221, %224 : vector<8x128xi1>, vector<8x128xf32>
    %c0_109 = arith.constant 0 : index
    %c0_110 = arith.constant 0 : index
    %c0_111 = arith.constant 0 : index
    %226 = vector.load %arg12[%c0_109, %c0_110, %c0_111] : memref<3x128x128xf32, #tpu.memory_space<vmem>>, vector<1x128x128xf32>
    %227 = vector.shape_cast %226 : vector<1x128x128xf32> to vector<128x128xf32>
    %c1_112 = arith.constant 1 : index
    %c0_113 = arith.constant 0 : index
    %c0_114 = arith.constant 0 : index
    %228 = vector.load %arg12[%c1_112, %c0_113, %c0_114] : memref<3x128x128xf32, #tpu.memory_space<vmem>>, vector<1x128x128xf32>
    %229 = vector.shape_cast %228 : vector<1x128x128xf32> to vector<128x128xf32>
    %c2_115 = arith.constant 2 : index
    %c0_116 = arith.constant 0 : index
    %c0_117 = arith.constant 0 : index
    %230 = vector.load %arg12[%c2_115, %c0_116, %c0_117] : memref<3x128x128xf32, #tpu.memory_space<vmem>>, vector<1x128x128xf32>
    %231 = vector.shape_cast %230 : vector<1x128x128xf32> to vector<128x128xf32>
    %cst_118 = arith.constant dense<0.000000e+00> : vector<8x128xf32>
    %232 = tpu.matmul %212, %229, %cst_118 {dimension_numbers = #tpu.dot_dimension_numbers<[1], [0], [0], [1], [0, 0, 1, 1], [], []>} : vector<8x128xf32>, vector<128x128xf32>, vector<8x128xf32> -> vector<8x128xf32>
    %cst_119 = arith.constant dense<0.000000e+00> : vector<8x128xf32>
    %233 = tpu.matmul %219, %227, %cst_119 {dimension_numbers = #tpu.dot_dimension_numbers<[1], [0], [0], [1], [0, 0, 1, 1], [], []>} : vector<8x128xf32>, vector<128x128xf32>, vector<8x128xf32> -> vector<8x128xf32>
    %234 = arith.addf %232, %233 : vector<8x128xf32>
    %cst_120 = arith.constant dense<0.000000e+00> : vector<8x128xf32>
    %235 = tpu.matmul %225, %231, %cst_120 {dimension_numbers = #tpu.dot_dimension_numbers<[1], [0], [0], [1], [0, 0, 1, 1], [], []>} : vector<8x128xf32>, vector<128x128xf32>, vector<8x128xf32> -> vector<8x128xf32>
    %236 = arith.addf %234, %235 : vector<8x128xf32>
    %c0_121 = arith.constant 0 : index
    %c0_122 = arith.constant 0 : index
    %237 = vector.load %arg13[%c0_121, %c0_122] : memref<1x128xf32, #tpu.memory_space<vmem>>, vector<1x128xf32>
    %238 = vector.broadcast %237 : vector<1x128xf32> to vector<8x128xf32>
    %239 = arith.addf %236, %238 : vector<8x128xf32>
    %cst_123 = arith.constant 0.000000e+00 : f32
    %240 = vector.broadcast %cst_123 : f32 to vector<8x128xf32>
    %241 = arith.maximumf %239, %240 : vector<8x128xf32>
    %242 = vector.shape_cast %241 : vector<8x128xf32> to vector<4x2x128xf32>
    %cst_124 = arith.constant dense<0xFF800000> : vector<4x128xf32>
    %243 = vector.multi_reduction <maximumf>, %242, %cst_124 [1] : vector<4x2x128xf32> to vector<4x128xf32>
    %244 = vector.shape_cast %243 : vector<4x128xf32> to vector<2x256xf32>
    %c0_125 = arith.constant 0 : index
    %c0_126 = arith.constant 0 : index
    %245 = vector.load %arg14[%c0_125, %c0_126] : memref<256x64xf32, #tpu.memory_space<vmem>>, vector<256x64xf32>
    %cst_127 = arith.constant dense<0.000000e+00> : vector<2x64xf32>
    %246 = tpu.matmul %244, %245, %cst_127 {dimension_numbers = #tpu.dot_dimension_numbers<[1], [0], [0], [1], [0, 0, 1, 1], [], []>} : vector<2x256xf32>, vector<256x64xf32>, vector<2x64xf32> -> vector<2x64xf32>
    %c0_128 = arith.constant 0 : index
    %c0_129 = arith.constant 0 : index
    %247 = vector.load %arg15[%c0_128, %c0_129] : memref<1x64xf32, #tpu.memory_space<vmem>>, vector<1x64xf32>
    %248 = vector.broadcast %247 : vector<1x64xf32> to vector<2x64xf32>
    %249 = arith.addf %246, %248 : vector<2x64xf32>
    %cst_130 = arith.constant 0.000000e+00 : f32
    %250 = vector.broadcast %cst_130 : f32 to vector<2x64xf32>
    %251 = arith.maximumf %249, %250 : vector<2x64xf32>
    %c0_131 = arith.constant 0 : index
    %c0_132 = arith.constant 0 : index
    %252 = vector.load %arg16[%c0_131, %c0_132] : memref<64x5xf32, #tpu.memory_space<vmem>>, vector<64x5xf32>
    %cst_133 = arith.constant dense<0.000000e+00> : vector<2x5xf32>
    %253 = tpu.matmul %251, %252, %cst_133 {dimension_numbers = #tpu.dot_dimension_numbers<[1], [0], [0], [1], [0, 0, 1, 1], [], []>} : vector<2x64xf32>, vector<64x5xf32>, vector<2x5xf32> -> vector<2x5xf32>
    %c0_134 = arith.constant 0 : index
    %c0_135 = arith.constant 0 : index
    %254 = vector.load %arg17[%c0_134, %c0_135] : memref<1x5xf32, #tpu.memory_space<vmem>>, vector<1x5xf32>
    %255 = vector.broadcast %254 : vector<1x5xf32> to vector<2x5xf32>
    %256 = arith.addf %253, %255 : vector<2x5xf32>
    %cst_136 = arith.constant dense<0xFF800000> : vector<2xf32>
    %257 = vector.multi_reduction <maximumf>, %256, %cst_136 [1] : vector<2x5xf32> to vector<2xf32>
    %258 = vector.shape_cast %257 : vector<2xf32> to vector<2x1xf32>
    %259 = vector.broadcast %258 : vector<2x1xf32> to vector<2x5xf32>
    %260 = arith.subf %256, %259 : vector<2x5xf32>
    %261 = math.exp %260 : vector<2x5xf32>
    %cst_137 = arith.constant dense<0.000000e+00> : vector<2xf32>
    %262 = vector.multi_reduction <add>, %261, %cst_137 [1] : vector<2x5xf32> to vector<2xf32>
    %263 = vector.shape_cast %262 : vector<2xf32> to vector<2x1xf32>
    %264 = math.log %263 : vector<2x1xf32>
    %265 = vector.broadcast %264 : vector<2x1xf32> to vector<2x5xf32>
    %266 = arith.subf %260, %265 : vector<2x5xf32>
    %c0_138 = arith.constant 0 : index
    %c0_139 = arith.constant 0 : index
    %267 = vector.load %arg18[%c0_138, %c0_139] : memref<2x5xf32, #tpu.memory_space<vmem>>, vector<2x5xf32>
    tpu.vector_store %arg18[%c0_138, %c0_139], %266 {strides = array<i32>} : memref<2x5xf32, #tpu.memory_space<vmem>>, vector<2x5xf32>,
    return
  }
  func.func @transform_0(%arg0: i32) -> (i32, i32) {
    %c0_i32 = arith.constant 0 : i32
    %c0_i32_0 = arith.constant 0 : i32
    return %arg0, %c0_i32 : i32, i32
  }
  func.func @transform_1(%arg0: i32) -> (i32, i32, i32) {
    %c0_i32 = arith.constant 0 : i32
    %c0_i32_0 = arith.constant 0 : i32
    %c0_i32_1 = arith.constant 0 : i32
    %c0_i32_2 = arith.constant 0 : i32
    return %c0_i32, %c0_i32_0, %c0_i32_1 : i32, i32, i32
  }
  func.func @transform_2(%arg0: i32) -> (i32, i32) {
    %c0_i32 = arith.constant 0 : i32
    %c0_i32_0 = arith.constant 0 : i32
    %c0_i32_1 = arith.constant 0 : i32
    return %c0_i32, %c0_i32_0 : i32, i32
  }
  func.func @transform_3(%arg0: i32) -> (i32, i32, i32) {
    %c0_i32 = arith.constant 0 : i32
    %c0_i32_0 = arith.constant 0 : i32
    %c0_i32_1 = arith.constant 0 : i32
    %c0_i32_2 = arith.constant 0 : i32
    return %c0_i32, %c0_i32_0, %c0_i32_1 : i32, i32, i32
  }
  func.func @transform_4(%arg0: i32) -> (i32, i32) {
    %c0_i32 = arith.constant 0 : i32
    %c0_i32_0 = arith.constant 0 : i32
    %c0_i32_1 = arith.constant 0 : i32
    return %c0_i32, %c0_i32_0 : i32, i32
  }
  func.func @transform_5(%arg0: i32) -> (i32, i32, i32) {
    %c0_i32 = arith.constant 0 : i32
    %c0_i32_0 = arith.constant 0 : i32
    %c0_i32_1 = arith.constant 0 : i32
    %c0_i32_2 = arith.constant 0 : i32
    return %c0_i32, %c0_i32_0, %c0_i32_1 : i32, i32, i32
  }
  func.func @transform_6(%arg0: i32) -> (i32, i32) {
    %c0_i32 = arith.constant 0 : i32
    %c0_i32_0 = arith.constant 0 : i32
    %c0_i32_1 = arith.constant 0 : i32
    return %c0_i32, %c0_i32_0 : i32, i32
  }
  func.func @transform_7(%arg0: i32) -> (i32, i32, i32) {
    %c0_i32 = arith.constant 0 : i32
    %c0_i32_0 = arith.constant 0 : i32
    %c0_i32_1 = arith.constant 0 : i32
    %c0_i32_2 = arith.constant 0 : i32
    return %c0_i32, %c0_i32_0, %c0_i32_1 : i32, i32, i32
  }
  func.func @transform_8(%arg0: i32) -> (i32, i32) {
    %c0_i32 = arith.constant 0 : i32
    %c0_i32_0 = arith.constant 0 : i32
    %c0_i32_1 = arith.constant 0 : i32
    return %c0_i32, %c0_i32_0 : i32, i32
  }
  func.func @transform_9(%arg0: i32) -> (i32, i32, i32) {
    %c0_i32 = arith.constant 0 : i32
    %c0_i32_0 = arith.constant 0 : i32
    %c0_i32_1 = arith.constant 0 : i32
    %c0_i32_2 = arith.constant 0 : i32
    return %c0_i32, %c0_i32_0, %c0_i32_1 : i32, i32, i32
  }
  func.func @transform_10(%arg0: i32) -> (i32, i32) {
    %c0_i32 = arith.constant 0 : i32
    %c0_i32_0 = arith.constant 0 : i32
    %c0_i32_1 = arith.constant 0 : i32
    return %c0_i32, %c0_i32_0 : i32, i32
  }
  func.func @transform_11(%arg0: i32) -> (i32, i32, i32) {
    %c0_i32 = arith.constant 0 : i32
    %c0_i32_0 = arith.constant 0 : i32
    %c0_i32_1 = arith.constant 0 : i32
    %c0_i32_2 = arith.constant 0 : i32
    return %c0_i32, %c0_i32_0, %c0_i32_1 : i32, i32, i32
  }
  func.func @transform_12(%arg0: i32) -> (i32, i32) {
    %c0_i32 = arith.constant 0 : i32
    %c0_i32_0 = arith.constant 0 : i32
    %c0_i32_1 = arith.constant 0 : i32
    return %c0_i32, %c0_i32_0 : i32, i32
  }
  func.func @transform_13(%arg0: i32) -> (i32, i32) {
    %c0_i32 = arith.constant 0 : i32
    %c0_i32_0 = arith.constant 0 : i32
    %c0_i32_1 = arith.constant 0 : i32
    return %c0_i32, %c0_i32_0 : i32, i32
  }
  func.func @transform_14(%arg0: i32) -> (i32, i32) {
    %c0_i32 = arith.constant 0 : i32
    %c0_i32_0 = arith.constant 0 : i32
    %c0_i32_1 = arith.constant 0 : i32
    return %c0_i32, %c0_i32_0 : i32, i32
  }
  func.func @transform_15(%arg0: i32) -> (i32, i32) {
    %c0_i32 = arith.constant 0 : i32
    %c0_i32_0 = arith.constant 0 : i32
    %c0_i32_1 = arith.constant 0 : i32
    return %c0_i32, %c0_i32_0 : i32, i32
  }
  func.func @transform_16(%arg0: i32) -> (i32, i32) {
    %c0_i32 = arith.constant 0 : i32
    %c0_i32_0 = arith.constant 0 : i32
    %c0_i32_1 = arith.constant 0 : i32
    return %c0_i32, %c0_i32_0 : i32, i32
  }
  func.func @transform_17(%arg0: i32) -> (i32, i32) {
    %c0_i32 = arith.constant 0 : i32
    %c0_i32_0 = arith.constant 0 : i32
    return %arg0, %c0_i32 : i32, i32
  }
}

</mosaic_0001>

<bundles_post_ra>
// kernel: tpu_custom_call.1
= control target key start
LH: loop header
LB: loop body
LE: loop exit
PB: predicated region body
PF: predicated region fallthrough
CT: control target
= control target key end

     0   :  { %s2618_s0 = inlined_call_operand.vmem [shape: f32[32,4], index: 0, kind: input, shape index: {}]   ;;  %s2619_s1 = inlined_call_operand.hbm [shape: f32[3,4,32], index: 1, kind: input, shape index: {}]   ;;  %s2620_s2 = inlined_call_operand.vmem [shape: f32[1,32], index: 2, kind: input, shape index: {}]   ;;  %s2621_s3 = inlined_call_operand.vmem [shape: f32[3,32,32], index: 3, kind: input, shape index: {}]   ;;  %s2622_s4 = inlined_call_operand.vmem [shape: f32[1,32], index: 4, kind: input, shape index: {}]   ;;  %s2623_s5 = inlined_call_operand.hbm [shape: f32[3,32,64], index: 5, kind: input, shape index: {}]   ;;  %s2624_s6 = inlined_call_operand.vmem [shape: f32[1,64], index: 6, kind: input, shape index: {}]   ;;  %s2625_s7 = inlined_call_operand.hbm [shape: f32[3,64,64], index: 7, kind: input, shape index: {}]   ;;  %s2626_s8 = inlined_call_operand.vmem [shape: f32[1,64], index: 8, kind: input, shape index: {}]   ;;  %s2627_s9 = inlined_call_operand.hbm [shape: f32[3,64,128], index: 9, kind: input, shape index: {}]   ;;  %s2628_s10 = inlined_call_operand.vmem [shape: f32[1,128], index: 10, kind: input, shape index: {}]   ;;  %s2629_s11 = inlined_call_operand.vmem [shape: f32[3,128,128], index: 11, kind: input, shape index: {}]   ;;  %s2630_s12 = inlined_call_operand.vmem [shape: f32[1,128], index: 12, kind: input, shape index: {}]   ;;  %s2631_s13 = inlined_call_operand.vmem [shape: f32[256,64], index: 13, kind: input, shape index: {}]   ;;  %s2632_s14 = inlined_call_operand.vmem [shape: f32[1,64], index: 14, kind: input, shape index: {}]   ;;  %s2633_s15 = inlined_call_operand.vmem [shape: f32[64,5], index: 15, kind: input, shape index: {}]   ;;  %s2634_s16 = inlined_call_operand.vmem [shape: f32[1,5], index: 16, kind: input, shape index: {}]   ;;  %s2635_s17 = inlined_call_operand.hbm [shape: f32[2,5], index: 17, kind: output, shape index: {}]  }
   0x1   :  { %2637 = sst [smem:[#allocation15_spill]] %s2618_s0 }
   0x2   :  { %2638 = sst [smem:[#allocation16_spill]] %s2619_s1 }
   0x3   :  { %2639 = sst [smem:[#allocation17_spill]] %s2635_s17 }
   0x4   :  { %22 = vsyncpa [#allocation3], 0 }
   0x5   :  { %23 = vsyncpa [#allocation6], 0 }
   0x6   :  { %24 = vsyncpa [#allocation9], 0  ;;  %s51_s26 = sshll.u32 %s2623_s5, 4  ;;  %s52_s26 = int_to_ptr.hbm [resolvable:$true] %s51_s26 }
   0x7   :  { %25 = vsyncpa [#allocation4], 0  ;;  %s1859_s27 = smov [#allocation5]   ;;  %s2640_s30 = sld [smem:[#allocation16_spill]] }
   0x8   :  { %s53_s28 = sshll.u32 %s1859_s27, 4  ;;  %s1860_s19 = smov 128   ;;  %s54_s28 = int_to_ptr.vmem [resolvable:$true] %s53_s28 }
   0x9   :  { %s1861_s1 = smov 8   ;;  %s1862_s20 = smov [#allocation2]  }
   0xa   :  { %59 = dma.hbm_to_vmem [thread:$0]  %s52_s26, 1536, %s54_s28, [#allocation6], %s1860_s19, %s1860_s19, %s1861_s1  }
   0xb   :  { %s34_s21 = sshll.u32 %s1862_s20, 4  ;;  %s1863_s22 = smov 64   ;;  %s35_s21 = int_to_ptr.vmem [resolvable:$true] %s34_s21 }
   0xc   :  { %s1864_s23 = smov 4   ;;  %s66_s25 = sshll.u32 %s2625_s7, 4  ;;  %s67_s25 = int_to_ptr.hbm [resolvable:$true] %s66_s25 }
   0xd   :  { %s32_s18 = sshll.u32 %s2640_s30, 4  ;;  %s1865_s27 = smov [#allocation7]   ;;  %s33_s18 = int_to_ptr.hbm [resolvable:$true] %s32_s18 }
   0xe   :  { %40 = dma.hbm_to_vmem [thread:$0]  %s33_s18, 192, %s35_s21, [#allocation3], %s1863_s22, %s1863_s22, %s1864_s23  }
   0xf   :  { %s68_s17 = sshll.u32 %s1865_s27, 4  ;;  %s81_s30 = sshll.u32 %s2627_s9, 4  ;;  %s69_s17 = int_to_ptr.vmem [resolvable:$true] %s68_s17  ;;  %s82_s30 = int_to_ptr.hbm [resolvable:$true] %s81_s30 }
  0x10   :  { %74 = dma.hbm_to_vmem [thread:$0]  %s67_s25, 3072, %s69_s17, [#allocation6], %s1860_s19, %s1860_s19, %s1861_s1  }
  0x11   :  { %s1866_s26 = smov [#allocation8]  }
  0x12   :  { %s83_s28 = sshll.u32 %s1866_s26, 4  ;;  %s84_s28 = int_to_ptr.vmem [resolvable:$true] %s83_s28 }
  0x13   :  { %89 = dma.hbm_to_vmem [thread:$0]  %s82_s30, 3072, %s84_s28, [#allocation9], %s1860_s19, %s1860_s19, %s1861_s1  }
  0x14   :  { %1851 = dma.done.wait [#allocation3], 192  }
  0x15   :  { %1852 = vsyncadd [#allocation3], 4294967104 }
  0x16   :  { %1853 = dma.done.wait [#allocation6], 4608  }
  0x17   :  { %1854 = vsyncadd [#allocation6], 4294962688 }
  0x18   :  { %1855 = dma.done.wait [#allocation9], 3072  }
  0x19   :  { %1856 = vsyncadd [#allocation9], 4294964224  ;;  %v120_v0 = vlaneseq  ;;  %vm299_vm0 = vcmask 1043456   ;;  %vm256_vm1 = vcmask 1046528   ;;  %v285_v4 = vld [vmem:[#allocation2 + $0x8] sm:$0xf] }
  0x1a   :  { %s2641_s17 = sld [smem:[#allocation15_spill]]  ;;  %vm286_vm2 = vcmask 31744   ;;  %vm231_vm3 = vcmask 1040384   ;;  %1633 = vmatpush.msk.msra.mxu2 %vm299_vm0, %v285_v4  ;;  %v281_v9 = vld [vmem:[#allocation2] sm:$0xf]  ;;  %v1641_v17 = vld [vmem:[%s2621_s3 + $0x38] sm:$0xff] }
  0x1b   :  { %v1971_v1 = vshrl.u32 %v120_v0, 7  ;;  %v283_v10 = vld [vmem:[#allocation2 + $0x4] sm:$0xf]  ;;  %1623 = vmatpush.msk.msra.mxu0 %vm299_vm0, %v281_v9  ;;  %v471_v18 = vld [vmem:[%s2621_s3 + $0x18] sm:$0xff]  ;;  %v1640_v20 = vld [vmem:[%s2621_s3 + $0x30] sm:$0xff]  ;;  %vm482_vm8 = vcmask 261120  }
  0x1c   :  { %1628 = vmatpush.msk.msra.mxu1 %vm299_vm0, %v283_v10  ;;  %1708 = vmatpush.msk.msra.mxu3 %vm299_vm0, %v283_v10  ;;  %v470_v43 = vld [vmem:[%s2621_s3 + $0x10] sm:$0xff]  ;;  %v1639_v44 = vld [vmem:[%s2621_s3 + $0x28] sm:$0xff]  ;;  %v1638_v45 = vld [vmem:[%s2621_s3 + $0x20] sm:$0xff]  ;;  %vm646_vm9 = vcmask 254976   ;;  %vm774_vm10 = vcmask 1042434   ;;  %vm776_vm11 = vcmask 1043459  }
  0x1d   :  { %v129_v2 = vand.u32 15, %v1971_v1  ;;  %v1975_v3 = vadd.s32 8, %v1971_v1  ;;  %544 = vmatpush.msrb.mxu0 %v1641_v17  ;;  %v123_v25 = vadd.s32 16, %v1971_v1  ;;  %v124_v32 = vadd.s32 24, %v1971_v1  ;;  %v469_v46 = vld [vmem:[%s2621_s3 + $0x8] sm:$0xff]  ;;  %v1645_v47 = vld [vmem:[%s2621_s3 + $0x58] sm:$0xff] }
  0x1e   :  { %507 = vmatpush.msrb.mxu3 %v471_v18  ;;  %v468_v48 = vld [vmem:[%s2621_s3] sm:$0xff]  ;;  %585 = vmatpush.msrb.mxu1 %v1645_v47  ;;  %v1644_v49 = vld [vmem:[%s2621_s3 + $0x50] sm:$0xff]  ;;  %v1643_v50 = vld [vmem:[%s2621_s3 + $0x48] sm:$0xff]  ;;  %vm786_vm12 = vcmask 1041409   ;;  %vm778_vm13 = vcmask 1044484   ;;  %vm780_vm14 = vcmask 1045509  }
  0x1f   :  { %vm1986_vm4 = vcmp.ne.s32.totalorder %v129_v2, 0  ;;  %v136_v13 = vand.u32 15, %v1975_v3  ;;  %545 = vmatpush.msrb.mxu0 %v1640_v20  ;;  %v143_v29 = vand.u32 15, %v123_v25  ;;  %v150_v36 = vand.u32 15, %v124_v32  ;;  %v1642_v51 = vld [vmem:[%s2621_s3 + $0x40] sm:$0xff]  ;;  %s2662_s19 = sld [smem:[#allocation17_spill]] }
  0x20   :  { %v223_v5 = vld [vmem:[%s2641_s17] sm:$0xff]  ;;  %v224_v6 = vld [vmem:[%s2641_s17 + $0x8] sm:$0xff]  ;;  %v225_v14 = vld [vmem:[%s2641_s17 + $0x10] sm:$0xff]  ;;  %508 = vmatpush.msrb.mxu3 %v470_v43  ;;  %586 = vmatpush.msrb.mxu1 %v1644_v49  ;;  %vm782_vm15 = vcmask 1046534   ;;  %vm784_vm0 = vcmask 1047559  }
  0x21   :  { %v257_v7 = vrot.slane %v223_v5, 1  ;;  %v258_v8 = vrot.slane %v224_v6, 1  ;;  %v232_v12 = vrot.slane %v223_v5, 7  ;;  %1629 = vmatmul.msk.f32.vlgmr.msra.gmra.mxu1 %vm286_vm2, %v223_v5  ;;  %v260_v16 = vrot.slane %v225_v14, 1  ;;  %1631 = vmatmul.msk.f32.vlgmr.msra.gmra.mxu3 %vm286_vm2, %v225_v14  ;;  %v226_v27 = vld [vmem:[%s2641_s17 + $0x18] sm:$0xff]  ;;  %v834_v43 = vld [vmem:[#allocation5 + $0x38] sm:$0xff] }
  0x22   :  { %vm2012_vm5 = vcmp.ne.s32.totalorder %v136_v13, 15  ;;  %v233_v24 = vrot.slane %v224_v6, 7  ;;  %v235_v30 = vrot.slane %v225_v14, 7  ;;  %v262_v31 = vrot.slane %v226_v27, 1  ;;  %546 = vmatpush.msrb.mxu0 %v1639_v44  ;;  %509 = vmatpush.msrb.mxu3 %v469_v46  ;;  %v1719_v55 = vld [vmem:[%s2620_s2] ss:$0 sm:$0xff] }
  0x23   :  { %v259_v15 = vsel %vm256_vm1, %v257_v7, %v258_v8  ;;  %v243_v19 = vsel %vm231_vm3, 0.0, %v232_v12  ;;  %v261_v23 = vsel %vm256_vm1, %v258_v8, %v260_v16  ;;  %vm2029_vm6 = vcmp.ne.s32.totalorder %v143_v29, 0  ;;  %587 = vmatpush.msrb.mxu1 %v1643_v50  ;;  %v2110_v46 = vld [vmem:[%s2622_s4] ss:$0 sm:$0xff]  ;;  %v833_v47 = vld [vmem:[#allocation5 + $0x30] sm:$0xff] }
  0x24   :  { %1634 = vmatmul.msk.f32.vlgmr.msra.gmra.mxu2 %vm286_vm2, %v259_v15  ;;  %v252_v21 = vsel %vm1986_vm4, %v243_v19, 0.0  ;;  %v278_v26 = vsel %vm2012_vm5, %v261_v23, 0.0  ;;  %v234_v28 = vsel %vm231_vm3, %v232_v12, %v233_v24  ;;  %v236_v34 = vsel %vm231_vm3, %v233_v24, %v235_v30  ;;  %547 = vmatpush.msrb.mxu0 %v1638_v45  ;;  %v828_v49 = vld [vmem:[#allocation5 + $0x10] sm:$0xff]  ;;  %v832_v38 = vld [vmem:[#allocation5 + $0x28] sm:$0xff] }
  0x25   :  { %1624 = vmatmul.msk.f32.vlgmr.msra.gmra.mxu0 %vm286_vm2, %v252_v21  ;;  %v263_v35 = vsel %vm256_vm1, %v260_v16, %v262_v31  ;;  %v254_v37 = vsel %vm2029_vm6, %v236_v34, 0.0  ;;  %vm2039_vm7 = vcmp.ne.s32.totalorder %v150_v36, 15  ;;  %v268_v39 = vsel %vm256_vm1, %v262_v31, 0.0  ;;  %510 = vmatpush.msrb.mxu3 %v468_v48  ;;  %s1611_s1 = sshll.u32 %s2662_s19, 4  ;;  %s1612_s1 = int_to_ptr.hbm [resolvable:$true] %s1611_s1 }
  0x26   :  { %v237_v40 = vrot.slane %v226_v27, 7  ;;  %v280_v41 = vsel %vm2039_vm7, %v268_v39, 0.0  ;;  %588 = vmatpush.msrb.mxu1 %v1642_v51 }
  0x27   :  { %899 = vmatpush.msra.mxu3 %v834_v43 }
  0x28   :  { %v238_v42 = vsel %vm231_vm3, %v235_v30, %v237_v40 }
  0x29   :  { %1630 = vmatmul.msk.f32.gmra.mxu1 %vm286_vm2, %v224_v6  ;;  %1632 = vmatmul.msk.f32.gmra.mxu3 %vm286_vm2, %v226_v27 }
  0x2a   :  { %900 = vmatpush.msra.mxu3 %v833_v47 }
  0x2c   :  { %1635 = vmatmul.msk.f32.gmra.mxu2 %vm286_vm2, %v278_v26  ;;  %901 = vmatpush.msra.mxu3 %v832_v38 }
  0x2d   :  { %1625 = vmatmul.msk.f32.gmra.mxu0 %vm286_vm2, %v234_v28 }
  0x34   :  { %1636 = vmatmul.msk.f32.gmra.mxu2 %vm286_vm2, %v263_v35 }
  0x35   :  { %1626 = vmatmul.msk.f32.gmra.mxu0 %vm286_vm2, %v254_v37 }
  0x3c   :  { %1637 = vmatmul.msk.f32.gmra.mxu2 %vm286_vm2, %v280_v41  ;;  %v829_v41 = vld [vmem:[#allocation5 + $0x18] sm:$0xff] }
  0x3d   :  { %1627 = vmatmul.msk.f32.gmra.mxu0 %vm286_vm2, %v238_v42  ;;  %858 = vmatpush.msrb.mxu2 %v829_v41 }
  0x3f   :  { %859 = vmatpush.msrb.mxu2 %v828_v49 }
  0x9e   :  { %v360_v52 = vpop.f32.mrf.mxu1 }
  0xa2   :  { %v320_v53 = vpop.f32.mrf.mxu0 }
  0xa3   :  { %v361_v54 = vadd.f32 %v360_v52, %v320_v53  ;;  %v827_v52 = vld [vmem:[#allocation5 + $0x8] sm:$0xff]  ;;  %v831_v53 = vld [vmem:[#allocation5 + $0x20] sm:$0xff] }
  0xa4   :  { %v366_v2 = vpop.f32.mrf.mxu3  ;;  %860 = vmatpush.msrb.mxu2 %v827_v52  ;;  %902 = vmatpush.msra.mxu3 %v831_v53  ;;  %v185_v53 = vand.u32 7, %v1971_v1 }
  0xa6   :  { %v363_v58 = vpop.f32.mrf.mxu1  ;;  %vm2154_vm2 = vcmp.ne.s32.totalorder %v185_v53, 0 }
  0xa7   :  { %v404_v56 = vpop.f32.mrf.mxu2 }
  0xa8   :  { %v416_v57 = vadd.f32 %v404_v56, %v361_v54 }
  0xaa   :  { %v424_v59 = vadd.f32 %v1719_v55, %v416_v57  ;;  %v323_v60 = vpop.f32.mrf.mxu0 }
  0xab   :  { %v364_v62 = vadd.f32 %v363_v58, %v323_v60 }
  0xac   :  { %v428_v61 = vmax.f32 %v424_v59, 0.0  ;;  %v369_v11 = vpop.f32.mrf.mxu3 }
  0xae   :  { %1650 = vmatmul.msk.f32.vlgmr.msrb.gmra.mxu0 %vm482_vm8, %v428_v61  ;;  %v436_v63 = vrot.slane %v428_v61, 7  ;;  %v452_v12 = vrot.slane %v428_v61, 1 }
  0xaf   :  { %v407_v0 = vpop.f32.mrf.mxu2 }
  0xb0   :  { %v417_v4 = vadd.f32 %v407_v0, %v364_v62  ;;  %v447_v5 = vsel %vm231_vm3, 0.0, %v436_v63 }
  0xb1   :  { %v448_v6 = vsel %vm1986_vm4, %v447_v5, 0.0 }
  0xb2   :  { %v425_v7 = vadd.f32 %v1719_v55, %v417_v4  ;;  %1646 = vmatmul.msk.f32.vlgmr.msrb.gmra.mxu3 %vm482_vm8, %v448_v6  ;;  %v326_v8 = vpop.f32.mrf.mxu0 }
  0xb3   :  { %v367_v10 = vadd.f32 %v366_v2, %v326_v8 }
  0xb4   :  { %v429_v9 = vmax.f32 %v425_v7, 0.0 }
  0xb6   :  { %v453_v13 = vrot.slane %v429_v9, 1  ;;  %1651 = vmatmul.msk.f32.gmra.mxu0 %vm482_vm8, %v429_v9  ;;  %v437_v14 = vrot.slane %v429_v9, 7 }
  0xb7   :  { %v410_v15 = vpop.f32.mrf.mxu2 }
  0xb8   :  { %v418_v16 = vadd.f32 %v410_v15, %v367_v10  ;;  %v454_v17 = vsel %vm256_vm1, %v452_v12, %v453_v13  ;;  %v438_v18 = vsel %vm231_vm3, %v436_v63, %v437_v14  ;;  %v839_v10 = vld [vmem:[#allocation5 + $0x58] sm:$0xff]  ;;  %v838_v12 = vld [vmem:[#allocation5 + $0x50] sm:$0xff] }
  0xb9   :  { %1654 = vmatmul.msk.f32.vlgmr.msrb.gmra.mxu1 %vm482_vm8, %v454_v17 }
  0xba   :  { %v426_v19 = vadd.f32 %v1719_v55, %v418_v16  ;;  %1647 = vmatmul.msk.f32.gmra.mxu3 %vm482_vm8, %v438_v18  ;;  %v329_v20 = vpop.f32.mrf.mxu0 }
  0xbb   :  { %v370_v23 = vadd.f32 %v369_v11, %v329_v20 }
  0xbc   :  { %v430_v21 = vmax.f32 %v426_v19, 0.0 }
  0xbe   :  { %1652 = vmatmul.msk.f32.gmra.mxu0 %vm482_vm8, %v430_v21  ;;  %v439_v24 = vrot.slane %v430_v21, 7  ;;  %v455_v25 = vrot.slane %v430_v21, 1 }
  0xbf   :  { %v413_v26 = vpop.f32.mrf.mxu2 }
  0xc0   :  { %v419_v27 = vadd.f32 %v413_v26, %v370_v23  ;;  %v440_v28 = vsel %vm231_vm3, %v437_v14, %v439_v24  ;;  %v456_v29 = vsel %vm256_vm1, %v453_v13, %v455_v25 }
  0xc1   :  { %v450_v30 = vsel %vm2029_vm6, %v440_v28, 0.0  ;;  %v465_v31 = vsel %vm2012_vm5, %v456_v29, 0.0  ;;  %vm2230_vm5 = vcmp.ne.s32.totalorder %v185_v53, 7 }
  0xc2   :  { %v427_v32 = vadd.f32 %v1719_v55, %v419_v27  ;;  %1648 = vmatmul.msk.f32.gmra.mxu3 %vm482_vm8, %v450_v30  ;;  %1655 = vmatmul.msk.f32.gmra.mxu1 %vm482_vm8, %v465_v31  ;;  %v826_v55 = vld [vmem:[#allocation5] sm:$0xff] }
  0xc3   :  { %861 = vmatpush.msrb.mxu2 %v826_v55 }
  0xc4   :  { %v431_v34 = vmax.f32 %v427_v32, 0.0 }
  0xc5   :  { %928 = vmatpush.msra.mxu2 %v839_v10 }
  0xc6   :  { %1653 = vmatmul.msk.f32.gmra.mxu0 %vm482_vm8, %v431_v34  ;;  %v441_v35 = vrot.slane %v431_v34, 7  ;;  %v457_v36 = vrot.slane %v431_v34, 1 }
  0xc7   :  { %929 = vmatpush.msra.mxu2 %v838_v12  ;;  %v837_v12 = vld [vmem:[#allocation5 + $0x48] sm:$0xff] }
  0xc8   :  { %v442_v37 = vsel %vm231_vm3, %v439_v24, %v441_v35  ;;  %v458_v39 = vsel %vm256_vm1, %v455_v25, %v457_v36  ;;  %v463_v22 = vsel %vm256_vm1, %v457_v36, 0.0 }
  0xc9   :  { %v467_v33 = vsel %vm2039_vm7, %v463_v22, 0.0  ;;  %930 = vmatpush.msra.mxu2 %v837_v12  ;;  %vm993_vm7 = vcmask 523264  }
  0xca   :  { %1649 = vmatmul.msk.f32.gmra.mxu3 %vm482_vm8, %v442_v37  ;;  %1656 = vmatmul.msk.f32.gmra.mxu1 %vm482_vm8, %v458_v39 }
  0xd2   :  { %1657 = vmatmul.msk.f32.gmra.mxu1 %vm482_vm8, %v467_v33 }
 0x12b   :  { %v549_v40 = vpop.f32.mrf.mxu0 }
 0x133   :  { %v552_v50 = vpop.f32.mrf.mxu0 }
 0x135   :  { %v512_v42 = vpop.f32.mrf.mxu3 }
 0x136   :  { %v550_v44 = vadd.f32 %v549_v40, %v512_v42  ;;  %v590_v45 = vpop.f32.mrf.mxu1 }
 0x138   :  { %v602_v48 = vadd.f32 %v590_v45, %v550_v44 }
 0x13a   :  { %v610_v51 = vadd.f32 %v2110_v46, %v602_v48 }
 0x13b   :  { %v555_v17 = vpop.f32.mrf.mxu0 }
 0x13c   :  { %v614_v54 = vmax.f32 %v610_v51, 0.0 }
 0x13d   :  { %v515_v56 = vpop.f32.mrf.mxu3 }
 0x13e   :  { %v622_v57 = vrot.slane %v614_v54, 2  ;;  %v623_v58 = vrot.slane %v614_v54, 4  ;;  %v624_v59 = vrot.slane %v614_v54, 6  ;;  %v647_v60 = vsel %vm646_vm9, %v614_v54, -inf }
 0x13f   :  { %v648_v61 = vrot.slane %v647_v60, 4  ;;  %v553_v62 = vadd.f32 %v552_v50, %v515_v56  ;;  %v593_v63 = vpop.f32.mrf.mxu1 }
 0x140   :  { %v654_v0 = vsel %vm646_vm9, %v622_v57, -inf  ;;  %v661_v2 = vsel %vm646_vm9, %v623_v58, -inf  ;;  %v668_v4 = vsel %vm646_vm9, %v624_v59, -inf }
 0x141   :  { %v649_v5 = vmax.f32 %v647_v60, %v648_v61  ;;  %v655_v6 = vrot.slane %v654_v0, 4  ;;  %v662_v7 = vrot.slane %v661_v2, 4  ;;  %v669_v8 = vrot.slane %v668_v4, 4 }
 0x142   :  { %v603_v9 = vadd.f32 %v593_v63, %v553_v62 }
 0x143   :  { %v650_v13 = vrot.slane %v649_v5, 2  ;;  %v656_v14 = vmax.f32 %v654_v0, %v655_v6  ;;  %v663_v15 = vmax.f32 %v661_v2, %v662_v7  ;;  %v670_v16 = vmax.f32 %v668_v4, %v669_v8  ;;  %v558_v58 = vpop.f32.mrf.mxu0 }
 0x144   :  { %v611_v18 = vadd.f32 %v2110_v46, %v603_v9 }
 0x145   :  { %v651_v11 = vmax.f32 %v649_v5, %v650_v13  ;;  %v657_v19 = vrot.slane %v656_v14, 2  ;;  %v664_v20 = vrot.slane %v663_v15, 2  ;;  %v671_v21 = vrot.slane %v670_v16, 2  ;;  %v518_v23 = vpop.f32.mrf.mxu3  ;;  %v836_v13 = vld [vmem:[#allocation5 + $0x40] sm:$0xff] }
 0x146   :  { %v615_v24 = vmax.f32 %v611_v18, 0.0  ;;  %v556_v25 = vadd.f32 %v555_v17, %v518_v23  ;;  %931 = vmatpush.msra.mxu2 %v836_v13 }
 0x147   :  { %v652_v26 = vrot.slane %v651_v11, 1  ;;  %v658_v27 = vmax.f32 %v656_v14, %v657_v19  ;;  %v665_v28 = vmax.f32 %v663_v15, %v664_v20  ;;  %v672_v29 = vmax.f32 %v670_v16, %v671_v21  ;;  %v596_v30 = vpop.f32.mrf.mxu1 }
 0x148   :  { %v625_v31 = vrot.slane %v615_v24, 2  ;;  %v626_v32 = vrot.slane %v615_v24, 4  ;;  %v627_v34 = vrot.slane %v615_v24, 6  ;;  %v675_v35 = vsel %vm646_vm9, %v615_v24, -inf }
 0x149   :  { %v653_v36 = vmax.f32 %v651_v11, %v652_v26  ;;  %v659_v37 = vrot.slane %v658_v27, 1  ;;  %v666_v39 = vrot.slane %v665_v28, 1  ;;  %v676_v22 = vrot.slane %v675_v35, 4 }
 0x14a   :  { %v682_v33 = vsel %vm646_vm9, %v625_v31, -inf  ;;  %v689_v40 = vsel %vm646_vm9, %v626_v32, -inf  ;;  %v696_v41 = vsel %vm646_vm9, %v627_v34, -inf  ;;  %v673_v44 = vrot.slane %v672_v29, 1 }
 0x14b   :  { %v2122_v42 = vmax.f32 %v658_v27, %v659_v37  ;;  %v2124_v43 = vmax.f32 %v665_v28, %v666_v39  ;;  %v683_v45 = vrot.slane %v682_v33, 4  ;;  %v677_v47 = vmax.f32 %v675_v35, %v676_v22 }
 0x14c   :  { %v690_v48 = vrot.slane %v689_v40, 4  ;;  %v697_v49 = vrot.slane %v696_v41, 4  ;;  %v604_v38 = vadd.f32 %v596_v30, %v556_v25  ;;  %v2134_v60 = vmax.f32 %v672_v29, %v673_v44 }
 0x14d   :  { %v684_v50 = vmax.f32 %v682_v33, %v683_v45  ;;  %v521_v51 = vpop.f32.mrf.mxu3  ;;  %v869_v52 = vsel %vm786_vm12, %v2122_v42, %v653_v36  ;;  %v775_v54 = vsel %vm774_vm10, %v2122_v42, %v653_v36  ;;  %v678_v55 = vrot.slane %v677_v47, 2 }
 0x14e   :  { %v691_v56 = vmax.f32 %v689_v40, %v690_v48  ;;  %v2131_v57 = vmax.f32 %v696_v41, %v697_v49  ;;  %v612_v59 = vadd.f32 %v2110_v46, %v604_v38  ;;  %v559_v62 = vadd.f32 %v558_v58, %v521_v51 }
 0x14f   :  { %v685_v61 = vrot.slane %v684_v50, 2  ;;  %v599_v63 = vpop.f32.mrf.mxu1  ;;  %v870_v0 = vsel %vm774_vm10, %v2124_v43, %v869_v52  ;;  %v679_v2 = vmax.f32 %v677_v47, %v678_v55  ;;  %v777_v6 = vsel %vm776_vm11, %v2124_v43, %v775_v54 }
 0x150   :  { %v692_v4 = vrot.slane %v691_v56, 2  ;;  %v616_v5 = vmax.f32 %v612_v59, 0.0  ;;  %v605_v8 = vadd.f32 %v599_v63, %v559_v62  ;;  %v699_v9 = vrot.slane %v2131_v57, 2 }
 0x151   :  { %v686_v7 = vmax.f32 %v684_v50, %v685_v61  ;;  %v871_v10 = vsel %vm776_vm11, %v2134_v60, %v870_v0  ;;  %v680_v14 = vrot.slane %v679_v2, 1  ;;  %v779_v25 = vsel %vm778_vm13, %v2134_v60, %v777_v6 }
 0x152   :  { %v628_v15 = vrot.slane %v616_v5, 2  ;;  %v629_v16 = vrot.slane %v616_v5, 4  ;;  %v630_v17 = vrot.slane %v616_v5, 6  ;;  %v703_v18 = vsel %vm646_vm9, %v616_v5, -inf }
 0x153   :  { %v613_v11 = vadd.f32 %v2110_v46, %v605_v8  ;;  %v687_v19 = vrot.slane %v686_v7, 1  ;;  %v693_v20 = vmax.f32 %v691_v56, %v692_v4  ;;  %v704_v21 = vrot.slane %v703_v18, 4 }
 0x154   :  { %v710_v23 = vsel %vm646_vm9, %v628_v15, -inf  ;;  %v717_v24 = vsel %vm646_vm9, %v629_v16, -inf  ;;  %v724_v28 = vsel %vm646_vm9, %v630_v17, -inf  ;;  %v2150_v30 = vmax.f32 %v679_v2, %v680_v14 }
 0x155   :  { %v711_v26 = vrot.slane %v710_v23, 4  ;;  %v718_v27 = vrot.slane %v717_v24, 4  ;;  %v617_v29 = vmax.f32 %v613_v11, 0.0  ;;  %v705_v46 = vmax.f32 %v703_v18, %v704_v21 }
 0x156   :  { %v725_v31 = vrot.slane %v724_v28, 4  ;;  %v694_v32 = vrot.slane %v693_v20, 1  ;;  %v2158_v39 = vmax.f32 %v686_v7, %v687_v19  ;;  %v700_v56 = vmax.f32 %v2131_v57, %v699_v9 }
 0x157   :  { %v712_v35 = vmax.f32 %v710_v23, %v711_v26  ;;  %v719_v36 = vmax.f32 %v717_v24, %v718_v27  ;;  %v631_v37 = vrot.slane %v617_v29, 2  ;;  %v706_v22 = vrot.slane %v705_v46, 2 }
 0x158   :  { %v726_v33 = vmax.f32 %v724_v28, %v725_v31  ;;  %v632_v40 = vrot.slane %v617_v29, 4  ;;  %v731_v41 = vsel %vm646_vm9, %v617_v29, -inf  ;;  %v2162_v51 = vmax.f32 %v693_v20, %v694_v32 }
 0x159   :  { %v713_v44 = vrot.slane %v712_v35, 2  ;;  %v720_v45 = vrot.slane %v719_v36, 2  ;;  %v732_v47 = vrot.slane %v731_v41, 4  ;;  %v738_v48 = vsel %vm646_vm9, %v631_v37, -inf }
 0x15a   :  { %v707_v49 = vmax.f32 %v705_v46, %v706_v22  ;;  %v727_v38 = vrot.slane %v726_v33, 2  ;;  %v739_v50 = vrot.slane %v738_v48, 4  ;;  %v872_v59 = vsel %vm778_vm13, %v2150_v30, %v871_v10 }
 0x15b   :  { %v714_v52 = vmax.f32 %v712_v35, %v713_v44  ;;  %v721_v54 = vmax.f32 %v719_v36, %v720_v45  ;;  %v733_v55 = vmax.f32 %v731_v41, %v732_v47  ;;  %v781_v61 = vsel %vm780_vm14, %v2150_v30, %v779_v25 }
 0x15c   :  { %v708_v58 = vrot.slane %v707_v49, 1  ;;  %v728_v62 = vmax.f32 %v726_v33, %v727_v38  ;;  %v701_v4 = vrot.slane %v700_v56, 1  ;;  %v633_v6 = vrot.slane %v617_v29, 6 }
 0x15d   :  { %v715_v63 = vrot.slane %v714_v52, 1  ;;  %v722_v0 = vrot.slane %v721_v54, 1  ;;  %v734_v2 = vrot.slane %v733_v55, 2  ;;  %v873_v7 = vsel %vm780_vm14, %v2158_v39, %v872_v59 }
 0x15e   :  { %v2169_v5 = vmax.f32 %v707_v49, %v708_v58  ;;  %v783_v57 = vsel %vm782_vm15, %v2158_v39, %v781_v61  ;;  %v702_v9 = vmax.f32 %v700_v56, %v701_v4  ;;  %v874_v10 = vsel %vm782_vm15, %v2162_v51, %v873_v7 }
 0x15f   :  { %v716_v8 = vmax.f32 %v714_v52, %v715_v63  ;;  %v785_v12 = vsel %vm784_vm0, %v2162_v51, %v783_v57  ;;  %v723_v14 = vmax.f32 %v721_v54, %v722_v0  ;;  %v729_v15 = vrot.slane %v728_v62, 1 }
 0x160   :  { %v796_v13 = vsel %vm231_vm3, 0.0, %v785_v12  ;;  %v735_v16 = vmax.f32 %v733_v55, %v734_v2  ;;  %v787_v17 = vsel %vm786_vm12, %v2169_v5, %v702_v9  ;;  %v875_v18 = vsel %vm784_vm0, %v702_v9, %v874_v10 }
 0x161   :  { %v801_v11 = vsel %vm2154_vm2, %v796_v13, 0.0  ;;  %v740_v19 = vmax.f32 %v738_v48, %v739_v50  ;;  %1660 = vmatmul.msk.f32.vlgmr.msra.gmra.mxu3 %vm482_vm8, %v875_v18  ;;  %v745_v21 = vsel %vm646_vm9, %v632_v40, -inf  ;;  %v788_v23 = vsel %vm774_vm10, %v716_v8, %v787_v17  ;;  %v991_v17 = vld [vmem:[#allocation7 + $0xb0] sm:$0xff]  ;;  %v981_v18 = vld [vmem:[#allocation7 + $0x68] sm:$0xff] }
 0x162   :  { %1658 = vmatmul.msk.f32.vlgmr.msrb.gmra.mxu2 %vm482_vm8, %v801_v11  ;;  %v736_v20 = vrot.slane %v735_v16, 1  ;;  %v752_v24 = vsel %vm646_vm9, %v633_v6, -inf  ;;  %v746_v26 = vrot.slane %v745_v21, 4  ;;  %v789_v27 = vsel %vm776_vm11, %v723_v14, %v788_v23  ;;  %v974_v11 = vld [vmem:[#allocation7 + $0x38] sm:$0xff]  ;;  %v972_v23 = vld [vmem:[#allocation7 + $0x28] sm:$0xff] }
 0x163   :  { %v741_v25 = vrot.slane %v740_v19, 2  ;;  %v753_v28 = vrot.slane %v752_v24, 4  ;;  %v730_v29 = vmax.f32 %v728_v62, %v729_v15  ;;  %v876_v31 = vsel %vm786_vm12, %v716_v8, %v2169_v5  ;;  %v992_v15 = vld [vmem:[#allocation7 + $0xb8] sm:$0xff]  ;;  %1008 = vmatpush.msrb.mxu3 %v974_v11  ;;  %v1195_v13 = vld [vmem:[#allocation8 + $0x28] sm:$0xff]  ;;  %v1212_v11 = vld [vmem:[#allocation8 + $0xa0] sm:$0xff] }
 0x164   :  { %v737_v46 = vmax.f32 %v735_v16, %v736_v20  ;;  %v747_v35 = vmax.f32 %v745_v21, %v746_v26  ;;  %v877_v37 = vsel %vm774_vm10, %v723_v14, %v876_v31  ;;  %v804_v44 = vsel %vm786_vm12, %v2124_v43, %v2122_v42  ;;  %v982_v16 = vld [vmem:[#allocation7 + $0x70] sm:$0xff]  ;;  %1064 = vmatpush.msra.mxu1 %v992_v15  ;;  %v980_v21 = vld [vmem:[#allocation7 + $0x60] sm:$0xff]  ;;  %v1213_v15 = vld [vmem:[#allocation8 + $0xa8] sm:$0xff] }
 0x165   :  { %v742_v32 = vmax.f32 %v740_v19, %v741_v25  ;;  %v754_v36 = vmax.f32 %v752_v24, %v753_v28  ;;  %v790_v22 = vsel %vm778_vm13, %v730_v29, %v789_v27  ;;  %v192_v45 = vand.u32 7, %v1975_v3  ;;  %v990_v19 = vld [vmem:[#allocation7 + $0xa8] sm:$0xff]  ;;  %v973_v20 = vld [vmem:[#allocation7 + $0x30] sm:$0xff]  ;;  %v989_v24 = vld [vmem:[#allocation7 + $0xa0] sm:$0xff] }
 0x166   :  { %v748_v40 = vrot.slane %v747_v35, 2  ;;  %v791_v47 = vsel %vm780_vm14, %v737_v46, %v790_v22  ;;  %v878_v48 = vsel %vm776_vm11, %v730_v29, %v877_v37  ;;  %v805_v54 = vsel %vm774_vm10, %v2134_v60, %v804_v44  ;;  %1065 = vmatpush.msra.mxu1 %v991_v17  ;;  %1009 = vmatpush.msrb.mxu3 %v973_v20  ;;  %v979_v25 = vld [vmem:[#allocation7 + $0x58] sm:$0xff]  ;;  %v971_v26 = vld [vmem:[#allocation7 + $0x20] sm:$0xff]  ;;  %v978_v27 = vld [vmem:[#allocation7 + $0x50] sm:$0xff] }
 0x167   :  { %v743_v33 = vrot.slane %v742_v32, 1  ;;  %v755_v41 = vrot.slane %v754_v36, 2  ;;  %v879_v52 = vsel %vm778_vm13, %v737_v46, %v878_v48  ;;  %v806_v58 = vsel %vm776_vm11, %v2150_v30, %v805_v54  ;;  %v970_v28 = vld [vmem:[#allocation7 + $0x18] sm:$0xff]  ;;  %v969_v31 = vld [vmem:[#allocation7 + $0x10] sm:$0xff]  ;;  %v967_v37 = vld [vmem:[#allocation7] sm:$0xff] }
 0x168   :  { %v749_v38 = vmax.f32 %v747_v35, %v748_v40  ;;  %vm2208_vm4 = vcmp.ne.s32.totalorder %v192_v45, 0  ;;  %v811_v61 = vsel %vm786_vm12, %v723_v14, %v716_v8  ;;  %v807_v60 = vsel %vm778_vm13, %v2158_v39, %v806_v58  ;;  %1066 = vmatpush.msra.mxu1 %v990_v19  ;;  %1010 = vmatpush.msrb.mxu3 %v972_v23  ;;  %v976_v35 = vld [vmem:[#allocation7 + $0x40] sm:$0xff]  ;;  %v986_v22 = vld [vmem:[#allocation7 + $0x88] sm:$0xff]  ;;  %v1193_v20 = vld [vmem:[#allocation8 + $0x18] sm:$0xff] }
 0x169   :  { %v744_v49 = vmax.f32 %v742_v32, %v743_v33  ;;  %v756_v50 = vmax.f32 %v754_v36, %v755_v41  ;;  %v812_v4 = vsel %vm774_vm10, %v730_v29, %v811_v61  ;;  %v808_v6 = vsel %vm780_vm14, %v2162_v51, %v807_v60  ;;  %v988_v29 = vld [vmem:[#allocation7 + $0x98] sm:$0xff]  ;;  %v987_v32 = vld [vmem:[#allocation7 + $0x90] sm:$0xff]  ;;  %v968_v36 = vld [vmem:[#allocation7 + $0x8] sm:$0xff] }
 0x16a   :  { %v750_v55 = vrot.slane %v749_v38, 1  ;;  %v813_v39 = vsel %vm776_vm11, %v737_v46, %v812_v4  ;;  %v809_v7 = vsel %vm782_vm15, %v702_v9, %v808_v6  ;;  %vm2241_vm6 = vcmp.ne.s32.totalorder %v192_v45, 7  ;;  %1067 = vmatpush.msra.mxu1 %v989_v24  ;;  %1011 = vmatpush.msrb.mxu3 %v971_v26  ;;  %v977_v46 = vld [vmem:[#allocation7 + $0x48] sm:$0xff]  ;;  %v985_v33 = vld [vmem:[#allocation7 + $0x80] sm:$0xff]  ;;  %v1211_v23 = vld [vmem:[#allocation8 + $0x98] sm:$0xff] }
 0x16b   :  { %v757_v56 = vrot.slane %v756_v50, 1  ;;  %v792_v42 = vsel %vm782_vm15, %v744_v49, %v791_v47  ;;  %v880_v3 = vsel %vm780_vm14, %v744_v49, %v879_v52  ;;  %v814_v57 = vsel %vm778_vm13, %v744_v49, %v813_v39  ;;  %v1721_v47 = vld [vmem:[%s2624_s6] ss:$0 sm:$0xff]  ;;  %v1194_v17 = vld [vmem:[#allocation8 + $0x20] sm:$0xff]  ;;  %v1201_v26 = vld [vmem:[#allocation8 + $0x50] sm:$0xff] }
 0x16c   :  { %v751_v59 = vmax.f32 %v749_v38, %v750_v55  ;;  %v810_v10 = vsel %vm784_vm0, %v2169_v5, %v809_v7  ;;  %v983_v5 = vld [vmem:[#allocation7 + $0x78] sm:$0xff]  ;;  %1068 = vmatpush.msra.mxu1 %v988_v29  ;;  %1012 = vmatpush.msrb.mxu3 %v970_v28  ;;  %v2273_v8 = vld [vmem:[%s2626_s8] ss:$0 sm:$0xff]  ;;  %v1210_v28 = vld [vmem:[#allocation8 + $0x90] sm:$0xff] }
 0x16d   :  { %v758_v62 = vmax.f32 %v756_v50, %v757_v56  ;;  %v824_v51 = vsel %vm2230_vm5, %v810_v10, 0.0  ;;  %1035 = vmatpush.msra.mxu0 %v983_v5  ;;  %v1197_v7 = vld [vmem:[#allocation8 + $0x38] sm:$0xff]  ;;  %v1196_v10 = vld [vmem:[#allocation8 + $0x30] sm:$0xff]  ;;  %v1322_v29 = vld [vmem:[%s2629_s11 + $0x78] sm:$0xff] }
 0x16e   :  { %v793_v63 = vsel %vm784_vm0, %v751_v59, %v792_v42  ;;  %v881_v0 = vsel %vm782_vm15, %v751_v59, %v880_v3  ;;  %v815_v12 = vsel %vm780_vm14, %v751_v59, %v814_v57  ;;  %1069 = vmatpush.msra.mxu1 %v987_v32  ;;  %1013 = vmatpush.msrb.mxu3 %v969_v31  ;;  %v1206_v57 = vld [vmem:[#allocation8 + $0x78] sm:$0xff] }
 0x16f   :  { %v802_v30 = vsel %vm2208_vm4, %v793_v63, 0.0  ;;  %v882_v2 = vsel %vm784_vm0, %v758_v62, %v881_v0  ;;  %v816_v9 = vsel %vm782_vm15, %v758_v62, %v815_v12  ;;  %1036 = vmatpush.msra.mxu0 %v982_v16  ;;  %1227 = vmatpush.msrb.mxu2 %v1197_v7  ;;  %v1205_v12 = vld [vmem:[#allocation8 + $0x70] sm:$0xff] }
 0x170   :  { %1659 = vmatmul.msk.f32.gmra.mxu2 %vm482_vm8, %v802_v30  ;;  %1661 = vmatmul.msk.f32.gmra.mxu3 %vm482_vm8, %v882_v2  ;;  %v819_v53 = vsel %vm256_vm1, %v816_v9, 0.0 }
 0x171   :  { %v825_v14 = vsel %vm2241_vm6, %v819_v53, 0.0  ;;  %1037 = vmatpush.msra.mxu0 %v981_v18  ;;  %1014 = vmatpush.msrb.mxu3 %v968_v36  ;;  %v1204_v53 = vld [vmem:[#allocation8 + $0x68] sm:$0xff]  ;;  %v1203_v18 = vld [vmem:[#allocation8 + $0x60] sm:$0xff] }
 0x172   :  { %1070 = vmatpush.msra.mxu1 %v986_v22  ;;  %1228 = vmatpush.msrb.mxu2 %v1196_v10  ;;  %v1200_v22 = vld [vmem:[#allocation8 + $0x48] sm:$0xff] }
 0x173   :  { %1038 = vmatpush.msra.mxu0 %v980_v21  ;;  %1015 = vmatpush.msrb.mxu3 %v967_v37  ;;  %v1202_v21 = vld [vmem:[#allocation8 + $0x58] sm:$0xff]  ;;  %v1191_v37 = vld [vmem:[#allocation8 + $0x8] sm:$0xff] }
 0x174   :  { %1071 = vmatpush.msra.mxu1 %v985_v33  ;;  %1229 = vmatpush.msrb.mxu2 %v1195_v13 }
 0x175   :  { %1039 = vmatpush.msra.mxu0 %v979_v25  ;;  %1256 = vmatpush.msra.mxu3 %v1206_v57  ;;  %v1192_v25 = vld [vmem:[#allocation8 + $0x10] sm:$0xff] }
 0x176   :  { %1230 = vmatpush.msrb.mxu2 %v1194_v17  ;;  %1357 = vmatpush.msrb.mxu1 %v1322_v29 }
 0x177   :  { %1040 = vmatpush.msra.mxu0 %v978_v27  ;;  %1257 = vmatpush.msra.mxu3 %v1205_v12  ;;  %v1702_v12 = vld [vmem:[%s2629_s11 + $0x168] sm:$0xff] }
 0x178   :  { %1662 = vmatmul.msk.f32.vlgmr.msra.gmra.mxu2 %vm482_vm8, %v824_v51  ;;  %v1215_v51 = vld [vmem:[#allocation8 + $0xb8] sm:$0xff] }
 0x179   :  { %1041 = vmatpush.msra.mxu0 %v977_v46  ;;  %1258 = vmatpush.msra.mxu3 %v1204_v53 }
 0x17a   :  { %1231 = vmatpush.msrb.mxu2 %v1193_v20 }
 0x17b   :  { %1042 = vmatpush.msra.mxu0 %v976_v35  ;;  %1259 = vmatpush.msra.mxu3 %v1203_v18  ;;  %v1701_v18 = vld [vmem:[%s2629_s11 + $0x160] sm:$0xff] }
 0x17c   :  { %1232 = vmatpush.msrb.mxu2 %v1192_v25 }
 0x17d   :  { %1279 = vmatpush.msrb.mxu0 %v1215_v51  ;;  %1260 = vmatpush.msra.mxu3 %v1202_v21  ;;  %v1317_v51 = vld [vmem:[%s2629_s11 + $0x50] sm:$0xff] }
 0x17e   :  { %1233 = vmatpush.msrb.mxu2 %v1191_v37 }
 0x17f   :  { %1261 = vmatpush.msra.mxu3 %v1201_v26 }
 0x180   :  { %1663 = vmatmul.msk.f32.gmra.mxu2 %vm482_vm8, %v825_v14  ;;  %v1214_v14 = vld [vmem:[#allocation8 + $0xb0] sm:$0xff]  ;;  %vm1103_vm8 = vcmask 517120  }
 0x181   :  { %1280 = vmatpush.msrb.mxu0 %v1214_v14  ;;  %1262 = vmatpush.msra.mxu3 %v1200_v22  ;;  %v1685_v14 = vld [vmem:[%s2629_s11 + $0xe0] sm:$0xff]  ;;  %v1699_v22 = vld [vmem:[%s2629_s11 + $0x150] sm:$0xff] }
 0x183   :  { %1281 = vmatpush.msrb.mxu0 %v1213_v15 }
 0x185   :  { %1282 = vmatpush.msrb.mxu0 %v1212_v11  ;;  %v1316_v11 = vld [vmem:[%s2629_s11 + $0x48] sm:$0xff] }
 0x187   :  { %1283 = vmatpush.msrb.mxu0 %v1211_v23  ;;  %v1684_v23 = vld [vmem:[%s2629_s11 + $0xd8] sm:$0xff] }
 0x189   :  { %1284 = vmatpush.msrb.mxu0 %v1210_v28  ;;  %v1700_v28 = vld [vmem:[%s2629_s11 + $0x158] sm:$0xff] }
 0x1e4   :  { %v904_v44 = vpop.f32.mrf.mxu3 }
 0x1e5   :  { %v863_v40 = vpop.f32.mrf.mxu2 }
 0x1e6   :  { %v905_v45 = vadd.f32 %v904_v44, %v863_v40  ;;  %v1209_v44 = vld [vmem:[#allocation8 + $0x88] sm:$0xff] }
 0x1e7   :  { %1285 = vmatpush.msrb.mxu0 %v1209_v44  ;;  %v1682_v44 = vld [vmem:[%s2629_s11 + $0xc8] sm:$0xff] }
 0x1f3   :  { %v866_v41 = vpop.f32.mrf.mxu2  ;;  %v907_v50 = vpop.f32.mrf.mxu3 }
 0x1f4   :  { %v908_v54 = vadd.f32 %v907_v50, %v866_v41  ;;  %v1199_v50 = vld [vmem:[#allocation8 + $0x40] sm:$0xff] }
 0x1f5   :  { %1263 = vmatpush.msra.mxu3 %v1199_v50 }
 0x1fb   :  { %v933_v48 = vpop.f32.mrf.mxu2 }
 0x1fc   :  { %v939_v49 = vadd.f32 %v933_v48, %v905_v45  ;;  %v1321_v45 = vld [vmem:[%s2629_s11 + $0x70] sm:$0xff] }
 0x1fd   :  { %1358 = vmatpush.msrb.mxu1 %v1321_v45 }
 0x1fe   :  { %v945_v38 = vadd.f32 %v1721_v47, %v939_v49 }
 0x200   :  { %v947_v52 = vmax.f32 %v945_v38, 0.0  ;;  %v1190_v38 = vld [vmem:[#allocation8] sm:$0xff] }
 0x201   :  { %1234 = vmatpush.msrb.mxu2 %v1190_v38  ;;  %v1698_v38 = vld [vmem:[%s2629_s11 + $0x148] sm:$0xff] }
 0x202   :  { %v951_v55 = vrot.slane %v947_v52, 7  ;;  %1666 = vmatmul.msk.f32.vlgmr.msra.gmra.mxu0 %vm993_vm7, %v947_v52  ;;  %v959_v62 = vrot.slane %v947_v52, 1  ;;  %v1320_v52 = vld [vmem:[%s2629_s11 + $0x68] sm:$0xff] }
 0x203   :  { %v936_v56 = vpop.f32.mrf.mxu2  ;;  %1359 = vmatpush.msrb.mxu1 %v1320_v52 }
 0x204   :  { %v940_v58 = vadd.f32 %v936_v56, %v908_v54  ;;  %v956_v42 = vsel %vm231_vm3, 0.0, %v951_v55 }
 0x205   :  { %v957_v3 = vsel %vm2154_vm2, %v956_v42, 0.0  ;;  %v1208_v42 = vld [vmem:[#allocation8 + $0x80] sm:$0xff] }
 0x206   :  { %v946_v59 = vadd.f32 %v1721_v47, %v940_v58  ;;  %1664 = vmatmul.msk.f32.vlgmr.msrb.gmra.mxu3 %vm993_vm7, %v957_v3  ;;  %v1688_v3 = vld [vmem:[%s2629_s11 + $0xf8] sm:$0xff]  ;;  %1286 = vmatpush.msrb.mxu0 %v1208_v42 }
 0x207   :  { %1377 = vmatpush.msra.mxu2 %v1688_v3 }
 0x208   :  { %v948_v61 = vmax.f32 %v946_v59, 0.0 }
 0x20a   :  { %v960_v60 = vrot.slane %v948_v61, 1  ;;  %1667 = vmatmul.msk.f32.gmra.mxu0 %vm993_vm7, %v948_v61  ;;  %v952_v63 = vrot.slane %v948_v61, 7  ;;  %v1704_v61 = vld [vmem:[%s2629_s11 + $0x178] sm:$0xff] }
 0x20b   :  { %1397 = vmatpush.msrb.mxu3 %v1704_v61  ;;  %v213_v61 = vand.u32 3, %v1971_v1 }
 0x20c   :  { %v953_v0 = vsel %vm231_vm3, %v951_v55, %v952_v63  ;;  %v961_v30 = vsel %vm256_vm1, %v959_v62, %v960_v60  ;;  %v964_v4 = vsel %vm256_vm1, %v960_v60, 0.0  ;;  %v1319_v62 = vld [vmem:[%s2629_s11 + $0x60] sm:$0xff] }
 0x20d   :  { %v958_v2 = vsel %vm2208_vm4, %v953_v0, 0.0  ;;  %v965_v34 = vsel %vm2230_vm5, %v961_v30, 0.0  ;;  %v966_v6 = vsel %vm2241_vm6, %v964_v4, 0.0  ;;  %v1703_v4 = vld [vmem:[%s2629_s11 + $0x170] sm:$0xff]  ;;  %1360 = vmatpush.msrb.mxu1 %v1319_v62  ;;  %v1680_v62 = vld [vmem:[%s2629_s11 + $0xb8] sm:$0xff]  ;;  %vm2361_vm9 = vcmp.ne.s32.totalorder %v213_v61, 0 }
 0x20e   :  { %1665 = vmatmul.msk.f32.gmra.mxu3 %vm993_vm7, %v958_v2  ;;  %1668 = vmatmul.msk.f32.vlgmr.msra.gmra.mxu1 %vm993_vm7, %v965_v34  ;;  %v1687_v2 = vld [vmem:[%s2629_s11 + $0xf0] sm:$0xff]  ;;  %vm2377_vm2 = vcmp.ne.s32.totalorder %v213_v61, 3 }
 0x20f   :  { %1378 = vmatpush.msra.mxu2 %v1687_v2  ;;  %1398 = vmatpush.msrb.mxu3 %v1703_v4 }
 0x211   :  { %1399 = vmatpush.msrb.mxu3 %v1702_v12 }
 0x213   :  { %1400 = vmatpush.msrb.mxu3 %v1701_v18 }
 0x215   :  { %1401 = vmatpush.msrb.mxu3 %v1700_v28  ;;  %v1314_v28 = vld [vmem:[%s2629_s11 + $0x38] sm:$0xff] }
 0x216   :  { %1669 = vmatmul.msk.f32.gmra.mxu1 %vm993_vm7, %v966_v6  ;;  %v1318_v6 = vld [vmem:[%s2629_s11 + $0x58] sm:$0xff] }
 0x217   :  { %1361 = vmatpush.msrb.mxu1 %v1318_v6  ;;  %1402 = vmatpush.msrb.mxu3 %v1699_v22  ;;  %v1676_v22 = vld [vmem:[%s2629_s11 + $0x98] sm:$0xff] }
 0x219   :  { %1362 = vmatpush.msrb.mxu1 %v1317_v51  ;;  %1403 = vmatpush.msrb.mxu3 %v1698_v38  ;;  %v1673_v38 = vld [vmem:[%s2629_s11 + $0x80] sm:$0xff] }
 0x21b   :  { %1363 = vmatpush.msrb.mxu1 %v1316_v11  ;;  %v1724_v11 = vld [vmem:[%s2630_s12] ss:$0 sm:$0xff] }
 0x27f   :  { %v1044_v39 = vpop.f32.mrf.mxu0 }
 0x287   :  { %v1047_v46 = vpop.f32.mrf.mxu0 }
 0x289   :  { %v1017_v43 = vpop.f32.mrf.mxu3 }
 0x28a   :  { %v1045_v9 = vadd.f32 %v1044_v39, %v1017_v43  ;;  %v1686_v43 = vld [vmem:[%s2629_s11 + $0xe8] sm:$0xff] }
 0x28b   :  { %v1073_v5 = vpop.f32.mrf.mxu1  ;;  %1379 = vmatpush.msra.mxu2 %v1686_v43 }
 0x28c   :  { %v1079_v16 = vadd.f32 %v1073_v5, %v1045_v9 }
 0x28d   :  { %1380 = vmatpush.msra.mxu2 %v1685_v14 }
 0x28e   :  { %v1085_v19 = vadd.f32 %v2273_v8, %v1079_v16 }
 0x28f   :  { %1381 = vmatpush.msra.mxu2 %v1684_v23 }
 0x290   :  { %v1087_v24 = vmax.f32 %v1085_v19, 0.0 }
 0x291   :  { %v1020_v27 = vpop.f32.mrf.mxu3 }
 0x292   :  { %v1091_v31 = vrot.slane %v1087_v24, 2  ;;  %v1092_v32 = vrot.slane %v1087_v24, 4  ;;  %v1093_v35 = vrot.slane %v1087_v24, 6  ;;  %v1104_v36 = vsel %vm1103_vm8, %v1087_v24, -inf }
 0x293   :  { %v1105_v33 = vrot.slane %v1104_v36, 4  ;;  %v1048_v40 = vadd.f32 %v1047_v46, %v1020_v27  ;;  %v1076_v41 = vpop.f32.mrf.mxu1 }
 0x294   :  { %v1111_v47 = vsel %vm1103_vm8, %v1091_v31, -inf  ;;  %v1118_v48 = vsel %vm1103_vm8, %v1092_v32, -inf  ;;  %v1125_v49 = vsel %vm1103_vm8, %v1093_v35, -inf  ;;  %v1683_v31 = vld [vmem:[%s2629_s11 + $0xd0] sm:$0xff] }
 0x295   :  { %v1106_v54 = vmax.f32 %v1104_v36, %v1105_v33  ;;  %v1112_v55 = vrot.slane %v1111_v47, 4  ;;  %v1119_v56 = vrot.slane %v1118_v48, 4  ;;  %v1126_v58 = vrot.slane %v1125_v49, 4  ;;  %1382 = vmatpush.msra.mxu2 %v1683_v31  ;;  %v1313_v31 = vld [vmem:[%s2629_s11 + $0x30] sm:$0xff] }
 0x296   :  { %v1080_v59 = vadd.f32 %v1076_v41, %v1048_v40 }
 0x297   :  { %v1107_v60 = vrot.slane %v1106_v54, 2  ;;  %v1113_v63 = vmax.f32 %v1111_v47, %v1112_v55  ;;  %v1120_v0 = vmax.f32 %v1118_v48, %v1119_v56  ;;  %v1127_v30 = vmax.f32 %v1125_v49, %v1126_v58  ;;  %1383 = vmatpush.msra.mxu2 %v1682_v44  ;;  %v1310_v44 = vld [vmem:[%s2629_s11 + $0x18] sm:$0xff] }
 0x298   :  { %v1086_v34 = vadd.f32 %v2273_v8, %v1080_v59 }
 0x299   :  { %v1108_v39 = vmax.f32 %v1106_v54, %v1107_v60  ;;  %v1114_v7 = vrot.slane %v1113_v63, 2  ;;  %v1121_v57 = vrot.slane %v1120_v0, 2  ;;  %v1128_v10 = vrot.slane %v1127_v30, 2  ;;  %v1681_v54 = vld [vmem:[%s2629_s11 + $0xc0] sm:$0xff] }
 0x29a   :  { %v1088_v8 = vmax.f32 %v1086_v34, 0.0  ;;  %1384 = vmatpush.msra.mxu2 %v1681_v54  ;;  %v1307_v54 = vld [vmem:[%s2629_s11] sm:$0xff] }
 0x29b   :  { %v1109_v9 = vrot.slane %v1108_v39, 1  ;;  %v1115_v13 = vmax.f32 %v1113_v63, %v1114_v7  ;;  %v1122_v53 = vmax.f32 %v1120_v0, %v1121_v57  ;;  %v1129_v21 = vmax.f32 %v1127_v30, %v1128_v10  ;;  %v1484_v57 = vld [vmem:[%s2631_s13 + $0x60] sm:$0xff] }
 0x29c   :  { %v1094_v5 = vrot.slane %v1088_v8, 2  ;;  %v1095_v15 = vrot.slane %v1088_v8, 4  ;;  %v1096_v16 = vrot.slane %v1088_v8, 6  ;;  %v1132_v17 = vsel %vm1103_vm8, %v1088_v8, -inf  ;;  %1385 = vmatpush.msra.mxu2 %v1680_v62 }
 0x29d   :  { %v1116_v19 = vrot.slane %v1115_v13, 1  ;;  %v1123_v20 = vrot.slane %v1122_v53, 1  ;;  %v1133_v24 = vrot.slane %v1132_v17, 4  ;;  %v1110_v32 = vmax.f32 %v1108_v39, %v1109_v9 }
 0x29e   :  { %v1139_v25 = vsel %vm1103_vm8, %v1094_v5, -inf  ;;  %v1146_v26 = vsel %vm1103_vm8, %v1095_v15, -inf  ;;  %v1153_v27 = vsel %vm1103_vm8, %v1096_v16, -inf  ;;  %v1130_v40 = vrot.slane %v1129_v21, 1 }
 0x29f   :  { %v1117_v29 = vmax.f32 %v1115_v13, %v1116_v19  ;;  %v1140_v46 = vrot.slane %v1139_v25, 4  ;;  %v1134_v35 = vmax.f32 %v1132_v17, %v1133_v24  ;;  %v1147_v36 = vrot.slane %v1146_v26, 4 }
 0x2a0   :  { %v1154_v37 = vrot.slane %v1153_v27, 4  ;;  %v1124_v33 = vmax.f32 %v1122_v53, %v1123_v20  ;;  %v1131_v42 = vmax.f32 %v1129_v21, %v1130_v40  ;;  %v1693_v40 = vld [vmem:[%s2629_s11 + $0x120] sm:$0xff] }
 0x2a1   :  { %v1141_v41 = vmax.f32 %v1139_v25, %v1140_v46  ;;  %v1135_v45 = vrot.slane %v1134_v35, 2  ;;  %v1148_v47 = vmax.f32 %v1146_v26, %v1147_v36  ;;  %v1239_v49 = vsel %vm786_vm12, %v1117_v29, %v1110_v32  ;;  %v1315_v25 = vld [vmem:[%s2629_s11 + $0x40] sm:$0xff]  ;;  %v1678_v46 = vld [vmem:[%s2629_s11 + $0xa8] sm:$0xff] }
 0x2a2   :  { %v1155_v48 = vmax.f32 %v1153_v27, %v1154_v37  ;;  %v1167_v52 = vsel %vm774_vm10, %v1117_v29, %v1110_v32  ;;  %v1240_v59 = vsel %vm774_vm10, %v1124_v33, %v1239_v49  ;;  %v1179_v34 = vsel %vm786_vm12, %v1124_v33, %v1117_v29  ;;  %v1697_v26 = vld [vmem:[%s2629_s11 + $0x140] sm:$0xff]  ;;  %v1679_v27 = vld [vmem:[%s2629_s11 + $0xb0] sm:$0xff]  ;;  %1364 = vmatpush.msrb.mxu1 %v1315_v25  ;;  %v1696_v29 = vld [vmem:[%s2629_s11 + $0x138] sm:$0xff] }
 0x2a3   :  { %v1142_v50 = vrot.slane %v1141_v41, 2  ;;  %v1136_v55 = vmax.f32 %v1134_v35, %v1135_v45  ;;  %v1149_v56 = vrot.slane %v1148_v47, 2  ;;  %v1168_v30 = vsel %vm776_vm11, %v1124_v33, %v1167_v52  ;;  %1404 = vmatpush.msrb.mxu3 %v1697_v26  ;;  %1386 = vmatpush.msra.mxu2 %v1679_v27  ;;  %v1695_v32 = vld [vmem:[%s2629_s11 + $0x130] sm:$0xff]  ;;  %v1677_v35 = vld [vmem:[%s2629_s11 + $0xa0] sm:$0xff]  ;;  %v1312_v36 = vld [vmem:[%s2629_s11 + $0x28] sm:$0xff] }
 0x2a4   :  { %v1156_v58 = vrot.slane %v1155_v48, 2  ;;  %v1241_v1 = vsel %vm776_vm11, %v1131_v42, %v1240_v59  ;;  %v1169_v10 = vsel %vm778_vm13, %v1131_v42, %v1168_v30  ;;  %v1180_v51 = vsel %vm774_vm10, %v1131_v42, %v1179_v34  ;;  %1365 = vmatpush.msrb.mxu1 %v1314_v28  ;;  %v1694_v37 = vld [vmem:[%s2629_s11 + $0x128] sm:$0xff]  ;;  %v1311_v33 = vld [vmem:[%s2629_s11 + $0x20] sm:$0xff]  ;;  %v1692_v45 = vld [vmem:[%s2629_s11 + $0x118] sm:$0xff] }
 0x2a5   :  { %v1143_v3 = vmax.f32 %v1141_v41, %v1142_v50  ;;  %v1137_v60 = vrot.slane %v1136_v55, 1  ;;  %v1150_v63 = vmax.f32 %v1148_v47, %v1149_v56  ;;  %1405 = vmatpush.msrb.mxu3 %v1696_v29  ;;  %1387 = vmatpush.msra.mxu2 %v1678_v46  ;;  %v1675_v41 = vld [vmem:[%s2629_s11 + $0x90] sm:$0xff]  ;;  %v1674_v47 = vld [vmem:[%s2629_s11 + $0x88] sm:$0xff]  ;;  %v1487_v34 = vld [vmem:[%s2631_s13 + $0x78] sm:$0xff] }
 0x2a6   :  { %v1157_v0 = vmax.f32 %v1155_v48, %v1156_v58  ;;  %1366 = vmatpush.msrb.mxu1 %v1313_v31  ;;  %v1309_v48 = vld [vmem:[%s2629_s11 + $0x10] sm:$0xff]  ;;  %v1308_v50 = vld [vmem:[%s2629_s11 + $0x8] sm:$0xff]  ;;  %1514 = vmatpush.msra.mxu0 %v1487_v34  ;;  %v1562_v27 = vld [vmem:[%s2633_s15 + $0x38] sm:$0xff] }
 0x2a7   :  { %v1144_v2 = vrot.slane %v1143_v3, 1  ;;  %v1138_v4 = vmax.f32 %v1136_v55, %v1137_v60  ;;  %v1151_v6 = vrot.slane %v1150_v63, 1  ;;  %1406 = vmatpush.msrb.mxu3 %v1695_v32  ;;  %1388 = vmatpush.msra.mxu2 %v1677_v35  ;;  %v1691_v49 = vld [vmem:[%s2629_s11 + $0x110] sm:$0xff]  ;;  %v1690_v52 = vld [vmem:[%s2629_s11 + $0x108] sm:$0xff]  ;;  %v1689_v55 = vld [vmem:[%s2629_s11 + $0x100] sm:$0xff] }
 0x2a8   :  { %v1158_v39 = vrot.slane %v1157_v0, 1  ;;  %1367 = vmatpush.msrb.mxu1 %v1312_v36  ;;  %v1493_v25 = vld [vmem:[%s2631_s13 + $0xa8] sm:$0xff]  ;;  %v1561_v28 = vld [vmem:[%s2633_s15 + $0x30] sm:$0xff]  ;;  %v1476_v29 = vld [vmem:[%s2631_s13 + $0x20] sm:$0xff] }
 0x2a9   :  { %v1145_v7 = vmax.f32 %v1143_v3, %v1144_v2  ;;  %v1152_v43 = vmax.f32 %v1150_v63, %v1151_v6  ;;  %v1242_v8 = vsel %vm778_vm13, %v1138_v4, %v1241_v1  ;;  %v1170_v12 = vsel %vm780_vm14, %v1138_v4, %v1169_v10  ;;  %1407 = vmatpush.msrb.mxu3 %v1694_v37  ;;  %v1723_v3 = vld [vmem:[%s2628_s10] ss:$0 sm:$0xff]  ;;  %v1486_v6 = vld [vmem:[%s2631_s13 + $0x70] sm:$0xff]  ;;  %v1501_v1 = vld [vmem:[%s2631_s13 + $0xe8] sm:$0xff] }
 0x2aa   :  { %v1159_v9 = vmax.f32 %v1157_v0, %v1158_v39  ;;  %v1181_v14 = vsel %vm776_vm11, %v1138_v4, %v1180_v51  ;;  %1389 = vmatpush.msra.mxu2 %v1676_v22  ;;  %1368 = vmatpush.msrb.mxu1 %v1311_v33  ;;  %v1503_v4 = vld [vmem:[%s2631_s13 + $0xf8] sm:$0xff]  ;;  %v1502_v39 = vld [vmem:[%s2631_s13 + $0xf0] sm:$0xff]  ;;  %v1500_v10 = vld [vmem:[%s2631_s13 + $0xe0] sm:$0xff] }
 0x2ab   :  { %v1243_v13 = vsel %vm780_vm14, %v1145_v7, %v1242_v8  ;;  %v1171_v53 = vsel %vm782_vm15, %v1145_v7, %v1170_v12  ;;  %v1182_v16 = vsel %vm778_vm13, %v1145_v7, %v1181_v14  ;;  %1408 = vmatpush.msrb.mxu3 %v1693_v40  ;;  %1515 = vmatpush.msra.mxu0 %v1486_v6  ;;  %v1485_v7 = vld [vmem:[%s2631_s13 + $0x68] sm:$0xff]  ;;  %v1499_v8 = vld [vmem:[%s2631_s13 + $0xd8] sm:$0xff]  ;;  %v1482_v12 = vld [vmem:[%s2631_s13 + $0x50] sm:$0xff] }
 0x2ac   :  { %v1244_v5 = vsel %vm782_vm15, %v1152_v43, %v1243_v13  ;;  %v1172_v15 = vsel %vm784_vm0, %v1152_v43, %v1171_v53  ;;  %v1183_v19 = vsel %vm780_vm14, %v1152_v43, %v1182_v16  ;;  %1390 = vmatpush.msra.mxu2 %v1675_v41  ;;  %1369 = vmatpush.msrb.mxu1 %v1310_v44  ;;  %v1483_v43 = vld [vmem:[%s2631_s13 + $0x58] sm:$0xff]  ;;  %v1498_v51 = vld [vmem:[%s2631_s13 + $0xd0] sm:$0xff]  ;;  %v1497_v13 = vld [vmem:[%s2631_s13 + $0xc8] sm:$0xff] }
 0x2ad   :  { %v1245_v17 = vsel %vm784_vm0, %v1159_v9, %v1244_v5  ;;  %v1174_v18 = vsel %vm231_vm3, 0.0, %v1172_v15  ;;  %v1184_v21 = vsel %vm782_vm15, %v1159_v9, %v1183_v19  ;;  %1409 = vmatpush.msrb.mxu3 %v1692_v45  ;;  %1516 = vmatpush.msra.mxu0 %v1485_v7  ;;  %v1481_v9 = vld [vmem:[%s2631_s13 + $0x48] sm:$0xff]  ;;  %v1480_v53 = vld [vmem:[%s2631_s13 + $0x40] sm:$0xff]  ;;  %v1475_v35 = vld [vmem:[%s2631_s13 + $0x18] sm:$0xff]  ;;  %v1867_v7 = vmov 1966171168  }
 0x2ae   :  { %1671 = vmatmul.msk.f32.vlgmr.msra.gmra.mxu3 %vm993_vm7, %v1245_v17  ;;  %v1177_v20 = vsel %vm2361_vm9, %v1174_v18, 0.0  ;;  %v1186_v23 = vsel %vm256_vm1, %v1184_v21, 0.0  ;;  %1391 = vmatpush.msra.mxu2 %v1674_v47  ;;  %v1496_v14 = vld [vmem:[%s2631_s13 + $0xc0] sm:$0xff]  ;;  %v1479_v17 = vld [vmem:[%s2631_s13 + $0x38] sm:$0xff]  ;;  %v1494_v21 = vld [vmem:[%s2631_s13 + $0xb0] sm:$0xff] }
 0x2af   :  { %1670 = vmatmul.msk.f32.vlgmr.msrb.gmra.mxu2 %vm993_vm7, %v1177_v20  ;;  %v1189_v24 = vsel %vm2377_vm2, %v1186_v23, 0.0  ;;  %1370 = vmatpush.msrb.mxu1 %v1309_v48  ;;  %v1495_v18 = vld [vmem:[%s2631_s13 + $0xb8] sm:$0xff]  ;;  %v1478_v20 = vld [vmem:[%s2631_s13 + $0x30] sm:$0xff]  ;;  %v1492_v46 = vld [vmem:[%s2631_s13 + $0xa0] sm:$0xff] }
 0x2b0   :  { %1672 = vmatmul.msk.f32.vlgmr.msrb.gmra.mxu0 %vm993_vm7, %v1189_v24  ;;  %1410 = vmatpush.msrb.mxu3 %v1691_v49  ;;  %v1477_v24 = vld [vmem:[%s2631_s13 + $0x28] sm:$0xff]  ;;  %v1491_v36 = vld [vmem:[%s2631_s13 + $0x98] sm:$0xff]  ;;  %v1559_v41 = vld [vmem:[%s2633_s15 + $0x20] sm:$0xff] }
 0x2b1   :  { %1392 = vmatpush.msra.mxu2 %v1673_v38  ;;  %1371 = vmatpush.msrb.mxu1 %v1308_v50  ;;  %v1560_v32 = vld [vmem:[%s2633_s15 + $0x28] sm:$0xff]  ;;  %v1474_v45 = vld [vmem:[%s2631_s13 + $0x10] sm:$0xff] }
 0x2b2   :  { %1411 = vmatpush.msrb.mxu3 %v1690_v52  ;;  %1517 = vmatpush.msra.mxu0 %v1484_v57  ;;  %v1490_v47 = vld [vmem:[%s2631_s13 + $0x90] sm:$0xff] }
 0x2b3   :  { %1372 = vmatpush.msrb.mxu1 %v1307_v54  ;;  %1578 = vmatpush.msrb.mxu2 %v1562_v27 }
 0x2b4   :  { %1412 = vmatpush.msrb.mxu3 %v1689_v55  ;;  %1518 = vmatpush.msra.mxu0 %v1483_v43 }
 0x2b5   :  { %1534 = vmatpush.msra.mxu1 %v1503_v4  ;;  %1579 = vmatpush.msrb.mxu2 %v1561_v28  ;;  %v1726_v28 = vld [vmem:[%s2634_s16] ss:$0 sm:$0xff] }
 0x2b6   :  { %1519 = vmatpush.msra.mxu0 %v1482_v12 }
 0x2b7   :  { %1535 = vmatpush.msra.mxu1 %v1502_v39  ;;  %1580 = vmatpush.msrb.mxu2 %v1560_v32 }
 0x2b8   :  { %1520 = vmatpush.msra.mxu0 %v1481_v9 }
 0x2b9   :  { %1536 = vmatpush.msra.mxu1 %v1501_v1  ;;  %1581 = vmatpush.msrb.mxu2 %v1559_v41  ;;  %v1469_v1 = vunpack.c.l.s4 %v1867_v7 }
 0x2ba   :  { %1521 = vmatpush.msra.mxu0 %v1480_v53 }
 0x2bb   :  { %1537 = vmatpush.msra.mxu1 %v1500_v10  ;;  %v1470_v9 = vunpack.c.0.s8 %v1469_v1 }
 0x2bc   :  { %1522 = vmatpush.msra.mxu0 %v1479_v17 }
 0x2bd   :  { %1538 = vmatpush.msra.mxu1 %v1499_v8 }
 0x2be   :  { %1523 = vmatpush.msra.mxu0 %v1478_v20  ;;  %v1555_v20 = vld [vmem:[%s2633_s15] sm:$0xff] }
 0x2bf   :  { %1539 = vmatpush.msra.mxu1 %v1498_v51 }
 0x2c0   :  { %1524 = vmatpush.msra.mxu0 %v1477_v24 }
 0x2c1   :  { %1540 = vmatpush.msra.mxu1 %v1497_v13 }
 0x2c2   :  { %1525 = vmatpush.msra.mxu0 %v1476_v29 }
 0x2c3   :  { %1541 = vmatpush.msra.mxu1 %v1496_v14 }
 0x2c4   :  { %1526 = vmatpush.msra.mxu0 %v1475_v35 }
 0x2c5   :  { %1542 = vmatpush.msra.mxu1 %v1495_v18  ;;  %v1558_v18 = vld [vmem:[%s2633_s15 + $0x18] sm:$0xff] }
 0x2c6   :  { %1527 = vmatpush.msra.mxu0 %v1474_v45  ;;  %1582 = vmatpush.msrb.mxu2 %v1558_v18 }
 0x2c7   :  { %1543 = vmatpush.msra.mxu1 %v1494_v21  ;;  %v1725_v21 = vld [vmem:[%s2632_s14] ss:$0 sm:$0xff]  ;;  %s1868_s14 = smov [#allocation10]  }
 0x2c9   :  { %1544 = vmatpush.msra.mxu1 %v1493_v25 }
 0x2cb   :  { %1545 = vmatpush.msra.mxu1 %v1492_v46 }
 0x2cd   :  { %1546 = vmatpush.msra.mxu1 %v1491_v36 }
 0x2cf   :  { %1547 = vmatpush.msra.mxu1 %v1490_v47 }
 0x32d   :  { %v1288_v59 = vpop.f32.mrf.mxu0 }
 0x331   :  { %v1265_v56 = vpop.f32.mrf.mxu3 }
 0x332   :  { %v1236_v58 = vpop.f32.mrf.mxu2 }
 0x333   :  { %v1266_v42 = vadd.f32 %v1265_v56, %v1236_v58  ;;  %v1473_v56 = vld [vmem:[%s2631_s13 + $0x8] sm:$0xff] }
 0x334   :  { %v1489_v58 = vld [vmem:[%s2631_s13 + $0x88] sm:$0xff]  ;;  %1528 = vmatpush.msra.mxu0 %v1473_v56 }
 0x335   :  { %v1291_v61 = vadd.f32 %v1288_v59, %v1266_v42  ;;  %1548 = vmatpush.msra.mxu1 %v1489_v58 }
 0x337   :  { %v1296_v62 = vadd.f32 %v1723_v3, %v1291_v61 }
 0x339   :  { %v1297_v60 = vmax.f32 %v1296_v62, 0.0  ;;  %v1472_v62 = vld [vmem:[%s2631_s13] sm:$0xff] }
 0x33a   :  { %1529 = vmatpush.msra.mxu0 %v1472_v62 }
 0x33b   :  { %1393 = vmatmul.f32.vlgmr.msra.gmra.mxu2 %v1297_v60  ;;  %v1299_v63 = vrot.slane %v1297_v60, 7  ;;  %v1303_v0 = vrot.slane %v1297_v60, 1  ;;  %v1488_v60 = vld [vmem:[%s2631_s13 + $0x80] sm:$0xff] }
 0x33c   :  { %1549 = vmatpush.msra.mxu1 %v1488_v60 }
 0x33d   :  { %v1301_v30 = vsel %vm231_vm3, 0.0, %v1299_v63  ;;  %v1305_v2 = vsel %vm256_vm1, %v1303_v0, 0.0  ;;  %vm1431_vm1 = vcmask 1041408   ;;  %vm1590_vm3 = vcmask 33792  }
 0x33e   :  { %1705 = vmatmul.msk.f32.vlgmr.msrb.gmra.mxu1 %vm2361_vm9, %v1301_v30  ;;  %1706 = vmatmul.msk.f32.vlgmr.msrb.gmra.mxu3 %vm2377_vm2, %v1305_v2 }
 0x3bb   :  { %v1374_v5 = vpop.f32.mrf.mxu1 }
 0x3be   :  { %v1394_v15 = vpop.f32.mrf.mxu2 }
 0x3bf   :  { %v1395_v16 = vadd.f32 %v1394_v15, %v1374_v5 }
 0x3c1   :  { %v1414_v19 = vpop.f32.mrf.mxu3 }
 0x3c2   :  { %v1417_v23 = vadd.f32 %v1414_v19, %v1395_v16  ;;  %v1556_v19 = vld [vmem:[%s2633_s15 + $0x8] sm:$0xff] }
 0x3c4   :  { %v1422_v26 = vadd.f32 %v1724_v11, %v1417_v23  ;;  %v1557_v11 = vld [vmem:[%s2633_s15 + $0x10] sm:$0xff]  ;;  %s1609_s15 = sshll.u32 %s1868_s14, 4  ;;  %s1610_s15 = int_to_ptr.vmem [resolvable:$true] %s1609_s15 }
 0x3c5   :  { %1583 = vmatpush.msrb.mxu2 %v1557_v11 }
 0x3c6   :  { %v1423_v31 = vmax.f32 %v1422_v26, 0.0 }
 0x3c7   :  { %1584 = vmatpush.msrb.mxu2 %v1556_v19 }
 0x3c8   :  { %v1425_v37 = vrot.slane %v1423_v31, 2  ;;  %v1426_v22 = vrot.slane %v1423_v31, 4  ;;  %v1427_v33 = vrot.slane %v1423_v31, 6  ;;  %v1432_v40 = vsel %vm1431_vm1, %v1423_v31, -inf }
 0x3c9   :  { %v1433_v44 = vrot.slane %v1432_v40, 4  ;;  %1585 = vmatpush.msrb.mxu2 %v1555_v20 }
 0x3ca   :  { %v1439_v48 = vsel %vm1431_vm1, %v1425_v37, -inf  ;;  %v1446_v49 = vsel %vm1431_vm1, %v1426_v22, -inf  ;;  %v1453_v38 = vsel %vm1431_vm1, %v1427_v33, -inf }
 0x3cb   :  { %v1434_v50 = vmax.f32 %v1432_v40, %v1433_v44  ;;  %v1440_v52 = vrot.slane %v1439_v48, 4  ;;  %v1447_v54 = vrot.slane %v1446_v49, 4  ;;  %v1454_v55 = vrot.slane %v1453_v38, 4 }
 0x3cd   :  { %v1435_v42 = vrot.slane %v1434_v50, 2  ;;  %v1441_v3 = vmax.f32 %v1439_v48, %v1440_v52  ;;  %v1448_v59 = vmax.f32 %v1446_v49, %v1447_v54  ;;  %v1455_v61 = vmax.f32 %v1453_v38, %v1454_v55 }
 0x3cf   :  { %v1436_v63 = vmax.f32 %v1434_v50, %v1435_v42  ;;  %v1442_v0 = vrot.slane %v1441_v3, 2  ;;  %v1449_v30 = vrot.slane %v1448_v59, 2  ;;  %v1456_v2 = vrot.slane %v1455_v61, 2 }
 0x3d1   :  { %v1437_v34 = vrot.slane %v1436_v63, 1  ;;  %v1443_v4 = vmax.f32 %v1441_v3, %v1442_v0  ;;  %v1450_v6 = vmax.f32 %v1448_v59, %v1449_v30  ;;  %v1457_v39 = vmax.f32 %v1455_v61, %v1456_v2 }
 0x3d3   :  { %v1444_v57 = vrot.slane %v1443_v4, 1  ;;  %v1451_v10 = vrot.slane %v1450_v6, 1  ;;  %v1458_v43 = vrot.slane %v1457_v39, 1  ;;  %v1438_v8 = vmax.f32 %v1436_v63, %v1437_v34 }
 0x3d5   :  { %v1445_v12 = vmax.f32 %v1443_v4, %v1444_v57  ;;  %v1452_v51 = vmax.f32 %v1450_v6, %v1451_v10  ;;  %v1459_v13 = vmax.f32 %v1457_v39, %v1458_v43 }
 0x3d7   :  { %v1464_v53 = vsel %vm786_vm12, %v1445_v12, %v1438_v8 }
 0x3d8   :  { %v1465_v14 = vsel %vm774_vm10, %v1452_v51, %v1464_v53 }
 0x3d9   :  { %v1466_v5 = vsel %vm776_vm11, %v1459_v13, %v1465_v14 }
 0x3da   :  { %v1471_v15 = vperm.slane %v1466_v5, %v1470_v9 }
 0x3dc   :  { %1509 = vst [vmem:[#allocation1] ss:$2 sm:$0xff] %v1471_v15 }
 0x3e3   :  { %v1510_v16 = vld.sshfl [vmem:[#allocation1] sm:$0xff pattern:$0x75316420]  ;;  %v1511_v17 = vld.sshfl [vmem:[#allocation1 + $0x8] sm:$0xff pattern:$0x75316420] }
 0x3e4   :  { %1530 = vmatmul.f32.vlgmr.msra.gmra.mxu0 %v1510_v16  ;;  %1550 = vmatmul.f32.vlgmr.msra.gmra.mxu1 %v1511_v17 }
 0x461   :  { %v1531_v23 = vpop.f32.mrf.mxu0  ;;  %v1551_v25 = vpop.f32.mrf.mxu1 }
 0x462   :  { %v1532_v24 = vadd.f32 %v1725_v21, %v1531_v23 }
 0x464   :  { %v1552_v26 = vadd.f32 %v1551_v25, %v1532_v24 }
 0x466   :  { %v1554_v27 = vmax.f32 %v1552_v26, 0.0 }
 0x468   :  { %1707 = vmatmul.msk.f32.vlgmr.msrb.gmra.mxu2 %vm993_vm7, %v1554_v27 }
 0x4eb   :  { %v1587_v29 = vpop.f32.mrf.mxu2 }
 0x4ec   :  { %v1588_v46 = vadd.f32 %v1726_v28, %v1587_v29 }
 0x4ee   :  { %v1591_v31 = vsel %vm1590_vm3, %v1588_v46, -inf }
 0x4ef   :  { %1592 = vmax.xlane.f32.xlu0 %v1591_v31 }
 0x562   :  { %v1593_v32 = vpop.xlane.xlu0 %1592 }
 0x563   :  { %v1594_v35 = vsub.f32 %v1588_v46, %v1593_v32 }
 0x565   :  { %v1595_v36 = vmul.f32 1.442695, %v1594_v35 }
 0x567   :  { %1727 = vpow2.f32 %v1595_v36 }
 0x56d   :  { %v1728_v37 = vpop.eup %1727 }
 0x56e   :  { %v1597_v22 = vsel %vm1590_vm3, %v1728_v37, 0.0 }
 0x56f   :  { %1598 = vadd.xlane.f32.xlu0 %v1597_v22 }
 0x5e2   :  { %v1599_v33 = vpop.xlane.xlu0 %1598 }
 0x5e3   :  { %1729 = vlog2.f32 %v1599_v33 }
 0x5e9   :  { %v1730_v40 = vpop.eup %1729 }
 0x5ea   :  { %v1601_v41 = vmul.f32 0.6931472, %v1730_v40 }
 0x5ec   :  { %v1602_v44 = vsub.f32 %v1594_v35, %v1601_v41 }
 0x5ee   :  { %1603 = vst.msk [vmem:[#allocation10] sm:$0x3] %vm1590_vm3, %v1602_v44 }
 0x5ef   :  { %1614 = dma.vmem_to_hbm [thread:$0]  %s1610_s15, 32, %s1612_s1, [#allocation4]  }
 0x5f0   :  { %1857 = dma.done.wait [#allocation4], 32  }
 0x5f1   :  { %1858 = vsyncadd [#allocation4], 4294967264 }
 0x5f2   :  { %1619 = vsyncpa [#allocation3], 1 }
 0x5f3   :  { %1620 = vsyncpa [#allocation6], 1 }
 0x5f4   :  { %1621 = vsyncpa [#allocation9], 1 }
 0x5f5   :  { %1622 = vsyncpa [#allocation4], 1 }

</bundles_post_ra>
